<compile_context>
chip_gen: v6e
topology: v6e:2x2x1
jax: 0.10.0
libtpu: 0.0.40
codegen_flags: <defaults>
</compile_context>

<pallas_src>
import functools
import math

import jax
import jax.numpy as jnp
from jax import lax
from jax.experimental import pallas as pl
from jax.experimental.pallas import tpu as pltpu

_LANE = 128

_PARAM_ORDER = ("wq", "wk", "wv", "wfc", "g1", "be1",
                "w1", "b1", "w2", "b2", "g2", "be2")


def _round_up(x, m):
    return ((x + m - 1) // m) * m


def _pad_axis(a, axis, target):
    pad = target - a.shape[axis]
    if pad == 0:
        return a
    widths = [(0, 0)] * a.ndim
    widths[axis] = (0, pad)
    return jnp.pad(a, widths)


def _layer_norm_padded(x, gamma, beta, d_real, eps=1e-6):
    """LayerNorm over the last dim where only the first d_real features are
    real (the rest are zero padding; gamma/beta are zero there, so padded
    output features stay exactly zero)."""
    inv_n = 1.0 / d_real
    mean = jnp.sum(x, axis=-1, keepdims=True) * inv_n
    var = jnp.sum(x * x, axis=-1, keepdims=True) * inv_n - mean * mean
    var = jnp.maximum(var, 0.0)
    return (x - mean) * lax.rsqrt(var + eps) * gamma + beta


def encoder_stack_kernel(x_ref, bias_ref,
                         wq_ref, wk_ref, wv_ref, wfc_ref,
                         g1_ref, be1_ref,
                         w1_ref, fb1_ref, w2_ref, fb2_ref,
                         g2_ref, be2_ref,
                         out_ref, act_ref, *, d_model):
    """One full EncoderLayer per grid step; grid = (batch, layer)."""
    layer = pl.program_id(1)
    n_layers = pl.num_programs(1)
    n_head = wq_ref.shape[1]

    # Load this batch element's input into the cross-layer VMEM carry.
    @pl.when(layer == 0)
    def _():
        act_ref[...] = x_ref[0]

    x = act_ref[...]                       # (L, Dp) f32 current activation
    xb = x.astype(jnp.bfloat16)
    bias = bias_ref[0]                     # (1, L) additive key-mask bias

    # --- Multi-head self-attention (heads batched on the leading axis) ------
    # 1/sqrt(d_k) is pre-folded into wq by the wrapper.
    q_h, k_h, v_h = [], [], []
    for h in range(n_head):                # static unroll; full-K (Dp) 2-D dots
        q_h.append(jnp.dot(xb, wq_ref[0, h], preferred_element_type=jnp.float32))
        k_h.append(jnp.dot(xb, wk_ref[0, h], preferred_element_type=jnp.float32))
        v_h.append(jnp.dot(xb, wv_ref[0, h], preferred_element_type=jnp.float32))
    q = jnp.stack(q_h, axis=0).astype(jnp.bfloat16)   # (H, L, d_k)
    k = jnp.stack(k_h, axis=0).astype(jnp.bfloat16)   # (H, L, d_k)
    v = jnp.stack(v_h, axis=0).astype(jnp.bfloat16)   # (H, L, d_v)

    s = jnp.einsum('hlk,hmk->hlm', q, k,
                   preferred_element_type=jnp.float32)            # (H, L, L)
    s = s + bias                       # mask bias computed once, broadcast over heads
    s = s - jnp.max(s, axis=-1, keepdims=True)
    p = jnp.exp(s)
    p = p * pl.reciprocal(jnp.sum(p, axis=-1, keepdims=True), approx=True)

    ctx = jnp.einsum('hlm,hmv->hlv', p.astype(jnp.bfloat16), v,
                     preferred_element_type=jnp.float32)          # (H, L, d_v)
    proj = jnp.einsum('hlv,hvd->hld', ctx.astype(jnp.bfloat16), wfc_ref[0],
                      preferred_element_type=jnp.float32)         # (H, L, Dp)
    attn_out = jnp.sum(proj, axis=0)   # == concat(heads) @ W_fc, no lane concat

    # residual + LayerNorm (post-norm)
    x1 = _layer_norm_padded(attn_out + x, g1_ref[0], be1_ref[0], d_model)

    # --- Position-wise feed-forward -----------------------------------------
    h1 = jnp.maximum(
        jnp.dot(x1.astype(jnp.bfloat16), w1_ref[0],
                preferred_element_type=jnp.float32) + fb1_ref[0], 0.0)
    y = jnp.dot(h1.astype(jnp.bfloat16), w2_ref[0],
                preferred_element_type=jnp.float32) + fb2_ref[0]

    x2 = _layer_norm_padded(y + x1, g2_ref[0], be2_ref[0], d_model)

    act_ref[...] = x2                  # carry to the next layer (same batch elem)

    @pl.when(layer == n_layers - 1)
    def _():
        out_ref[0] = x2                # lane-dense store (Dp multiple of 128)


def prepare_encoder_params(layer_params, *, n_head, d_k, d_v, d_model, d_inner):
    """Pad/transpose/stack the per-layer PyTorch-layout params into the kernel
    layout: per-head (H, Dp, d) projection weights with 1/sqrt(d_k) folded into
    wq, bf16 matmul weights, f32 LayerNorm/bias params, stacked over layers."""
    d_pad = _round_up(d_model, _LANE)
    di_pad = _round_up(d_inner, _LANE)
    q_scale = 1.0 / math.sqrt(d_k)

    def prep(p):
        wq = p["wq"].reshape(d_model, n_head, d_k).transpose(1, 0, 2) * q_scale
        wk = p["wk"].reshape(d_model, n_head, d_k).transpose(1, 0, 2)
        wv = p["wv"].reshape(d_model, n_head, d_v).transpose(1, 0, 2)
        wfc = p["wfc"].reshape(n_head, d_v, d_model)
        return {
            "wq": _pad_axis(wq, 1, d_pad).astype(jnp.bfloat16),
            "wk": _pad_axis(wk, 1, d_pad).astype(jnp.bfloat16),
            "wv": _pad_axis(wv, 1, d_pad).astype(jnp.bfloat16),
            "wfc": _pad_axis(wfc, 2, d_pad).astype(jnp.bfloat16),
            "g1": _pad_axis(p["ln1_g"].reshape(1, -1), 1, d_pad).astype(jnp.float32),
            "be1": _pad_axis(p["ln1_b"].reshape(1, -1), 1, d_pad).astype(jnp.float32),
            "w1": _pad_axis(_pad_axis(p["w1"], 0, d_pad), 1, di_pad).astype(jnp.bfloat16),
            "b1": _pad_axis(p["b1"].reshape(1, -1), 1, di_pad).astype(jnp.float32),
            "w2": _pad_axis(_pad_axis(p["w2"], 0, di_pad), 1, d_pad).astype(jnp.bfloat16),
            "b2": _pad_axis(p["b2"].reshape(1, -1), 1, d_pad).astype(jnp.float32),
            "g2": _pad_axis(p["ln2_g"].reshape(1, -1), 1, d_pad).astype(jnp.float32),
            "be2": _pad_axis(p["ln2_b"].reshape(1, -1), 1, d_pad).astype(jnp.float32),
        }

    per_layer = [prep(p) for p in layer_params]
    stacked = {k: jnp.stack([pp[k] for pp in per_layer], axis=0)
               for k in _PARAM_ORDER}
    return stacked, d_pad, di_pad


def encoder_stack(x, src_mask, stacked, *, d_model, d_pad):
    B, L, _ = x.shape
    n_layers = stacked["wq"].shape[0]

    x_pad = _pad_axis(x.astype(jnp.float32), 2, d_pad)                    # (B, L, Dp)
    attn_bias = jnp.where(src_mask > 0, 0.0, -1e9).astype(jnp.float32)    # (B, 1, L)

    def act_spec():
        return pl.BlockSpec((1, L, d_pad), lambda b, l: (b, 0, 0))

    def weight_spec(arr):
        blk = (1,) + arr.shape[1:]
        zeros = (0,) * (arr.ndim - 1)
        return pl.BlockSpec(blk, lambda b, l, _z=zeros: (l,) + _z)

    # VMEM budget: double-buffered per-layer weights + activation blocks + carry.
    weight_bytes = sum(
        (stacked[k].size // n_layers) * stacked[k].dtype.itemsize
        for k in _PARAM_ORDER)
    act_bytes = L * d_pad * 4
    est = 2 * weight_bytes + 8 * act_bytes
    vmem_limit = int(min(max(4 * est, 32 << 20), 48 << 20))

    kernel = functools.partial(encoder_stack_kernel, d_model=d_model)
    return pl.pallas_call(
        kernel,
        out_shape=jax.ShapeDtypeStruct((B, L, d_pad), jnp.float32),
        grid=(B, n_layers),
        in_specs=[
            act_spec(),                                        # x (padded)
            pl.BlockSpec((1, 1, L), lambda b, l: (b, 0, 0)),   # additive mask bias
        ] + [weight_spec(stacked[k]) for k in _PARAM_ORDER],
        out_specs=act_spec(),
        scratch_shapes=[pltpu.VMEM((L, d_pad), jnp.float32)],  # cross-layer carry
        compiler_params=pltpu.CompilerParams(
            dimension_semantics=("parallel", "arbitrary"),
            vmem_limit_bytes=vmem_limit),
    )(x_pad, attn_bias, *[stacked[k] for k in _PARAM_ORDER])


def encoder_forward(enc_input, src_mask, layer_params, *, n_head, d_k, d_v,
                    d_model, d_inner):
    """Matches Encoder.forward(enc_input, src_mask) -> (enc_output,)."""
    stacked, d_pad, _ = prepare_encoder_params(
        layer_params, n_head=n_head, d_k=d_k, d_v=d_v,
        d_model=d_model, d_inner=d_inner)
    out_pad = encoder_stack(enc_input, src_mask, stacked,
                            d_model=d_model, d_pad=d_pad)
    return (out_pad[:, :, :d_model],)


def init_encoder_params(key, n_layers, n_head, d_k, d_v, d_model, d_inner):
    """Deterministic synthetic parameters (shapes match the PyTorch module)."""
    params = []
    for _ in range(n_layers):
        key, *ks = jax.random.split(key, 7)
        scale = 0.05
        p = {
            "wq": scale * jax.random.normal(ks[0], (d_model, n_head * d_k), jnp.float32),
            "wk": scale * jax.random.normal(ks[1], (d_model, n_head * d_k), jnp.float32),
            "wv": scale * jax.random.normal(ks[2], (d_model, n_head * d_v), jnp.float32),
            "wfc": scale * jax.random.normal(ks[3], (n_head * d_v, d_model), jnp.float32),
            "ln1_g": jnp.ones((1, d_model), jnp.float32),
            "ln1_b": jnp.zeros((1, d_model), jnp.float32),
            "w1": scale * jax.random.normal(ks[4], (d_model, d_inner), jnp.float32),
            "b1": jnp.zeros((1, d_inner), jnp.float32),
            "w2": scale * jax.random.normal(ks[5], (d_inner, d_model), jnp.float32),
            "b2": jnp.zeros((1, d_model), jnp.float32),
            "ln2_g": jnp.ones((1, d_model), jnp.float32),
            "ln2_b": jnp.zeros((1, d_model), jnp.float32),
        }
        params.append(p)
    return params


def encoder_reference(x, mask, layer_params, *, n_head, d_k, d_v):
    """Pure-JAX f32 reference of the PyTorch module's forward (for checking)."""
    def ln(v, g, b, eps=1e-6):
        mu = jnp.mean(v, axis=-1, keepdims=True)
        var = jnp.mean((v - mu) ** 2, axis=-1, keepdims=True)
        return (v - mu) * lax.rsqrt(var + eps) * g + b

    out = x
    for p in layer_params:
        B, L, _ = out.shape
        q = (out @ p["wq"]).reshape(B, L, n_head, d_k).transpose(0, 2, 1, 3)
        k = (out @ p["wk"]).reshape(B, L, n_head, d_k).transpose(0, 2, 1, 3)
        v = (out @ p["wv"]).reshape(B, L, n_head, d_v).transpose(0, 2, 1, 3)
        s = jnp.einsum('bhld,bhmd->bhlm', q, k) / math.sqrt(d_k)
        s = jnp.where(mask[:, None, :, :] == 0.0, -1e9, s)
        a = jax.nn.softmax(s, axis=-1)
        ctx = jnp.einsum('bhlm,bhmd->bhld', a, v)
        ctx = ctx.transpose(0, 2, 1, 3).reshape(B, L, n_head * d_v)
        attn_out = ctx @ p["wfc"]
        x1 = ln(attn_out + out, p["ln1_g"], p["ln1_b"])
        h1 = jax.nn.relu(x1 @ p["w1"] + p["b1"])
        y = h1 @ p["w2"] + p["b2"]
        out = ln(y + x1, p["ln2_g"], p["ln2_b"])
    return out


if __name__ == "__main__":
    # Small shapes consistent with the module's forward.
    n_layers, n_head, d_k, d_v = 2, 2, 16, 16
    d_model, d_inner = 32, 64
    B, L = 2, 8

    key = jax.random.PRNGKey(0)
    k_in, k_par = jax.random.split(key)
    enc_input = jax.random.normal(k_in, (B, L, d_model), jnp.float32)

    # src_mask: (B, 1, L), 1.0 = attend, 0.0 = masked (pad) key position.
    src_mask = jnp.ones((B, 1, L), jnp.float32).at[1, 0, L - 1].set(0.0)

    layer_params = init_encoder_params(k_par, n_layers, n_head, d_k, d_v,
                                       d_model, d_inner)

    (enc_output,) = encoder_forward(enc_input, src_mask, layer_params,
                                    n_head=n_head, d_k=d_k, d_v=d_v,
                                    d_model=d_model, d_inner=d_inner)
    enc_output = jax.block_until_ready(enc_output)
    assert enc_output.shape == (B, L, d_model)
    assert bool(jnp.all(jnp.isfinite(enc_output)))

    ref = encoder_reference(enc_input, src_mask, layer_params,
                            n_head=n_head, d_k=d_k, d_v=d_v)
    err = float(jnp.max(jnp.abs(enc_output - ref)))
    assert err < 1e-1, f"max abs error vs f32 reference too large: {err}"
    print("KERNEL_OK")
</pallas_src>

<mosaic_0001>
module attributes {stable_mosaic.version = 11 : i64} {
  func.func @encoder_stack_kernel(%arg0: i32, %arg1: i32, %arg2: memref<1x8x128xf32, #tpu.memory_space<vmem>>, %arg3: memref<1x1x8xf32, #tpu.memory_space<vmem>>, %arg4: memref<1x2x128x16xbf16, #tpu.memory_space<vmem>>, %arg5: memref<1x2x128x16xbf16, #tpu.memory_space<vmem>>, %arg6: memref<1x2x128x16xbf16, #tpu.memory_space<vmem>>, %arg7: memref<1x2x16x128xbf16, #tpu.memory_space<vmem>>, %arg8: memref<1x1x128xf32, #tpu.memory_space<vmem>>, %arg9: memref<1x1x128xf32, #tpu.memory_space<vmem>>, %arg10: memref<1x128x128xbf16, #tpu.memory_space<vmem>>, %arg11: memref<1x1x128xf32, #tpu.memory_space<vmem>>, %arg12: memref<1x128x128xbf16, #tpu.memory_space<vmem>>, %arg13: memref<1x1x128xf32, #tpu.memory_space<vmem>>, %arg14: memref<1x1x128xf32, #tpu.memory_space<vmem>>, %arg15: memref<1x1x128xf32, #tpu.memory_space<vmem>>, %arg16: memref<1x8x128xf32, #tpu.memory_space<vmem>>, %arg17: memref<8x128xf32, #tpu.memory_space<vmem>>) attributes {dimension_semantics = [#tpu.dimension_semantics<parallel>, #tpu.dimension_semantics<arbitrary>], iteration_bounds = array<i64: 2, 2>, scalar_prefetch = 0 : i64, scratch_operands = 1 : i64, tpu.core_type = #tpu.core_type<tc>, window_params = [{transform_indices = @transform_0, window_bounds = array<i64: 1, 8, 128>}, {transform_indices = @transform_1, window_bounds = array<i64: 1, 1, 8>}, {transform_indices = @transform_2, window_bounds = array<i64: 1, 2, 128, 16>}, {transform_indices = @transform_3, window_bounds = array<i64: 1, 2, 128, 16>}, {transform_indices = @transform_4, window_bounds = array<i64: 1, 2, 128, 16>}, {transform_indices = @transform_5, window_bounds = array<i64: 1, 2, 16, 128>}, {transform_indices = @transform_6, window_bounds = array<i64: 1, 1, 128>}, {transform_indices = @transform_7, window_bounds = array<i64: 1, 1, 128>}, {transform_indices = @transform_8, window_bounds = array<i64: 1, 128, 128>}, {transform_indices = @transform_9, window_bounds = array<i64: 1, 1, 128>}, {transform_indices = @transform_10, window_bounds = array<i64: 1, 128, 128>}, {transform_indices = @transform_11, window_bounds = array<i64: 1, 1, 128>}, {transform_indices = @transform_12, window_bounds = array<i64: 1, 1, 128>}, {transform_indices = @transform_13, window_bounds = array<i64: 1, 1, 128>}, {transform_indices = @transform_14, window_bounds = array<i64: 1, 8, 128>}]} {
    %c0_i32 = arith.constant 0 : i32
    %0 = arith.cmpi eq, %arg1, %c0_i32 : i32
    %1 = arith.extui %0 : i1 to i32
    %c0_i32_0 = arith.constant 0 : i32
    %2 = arith.cmpi ne, %1, %c0_i32_0 : i32
    scf.if %2 {
      %c0_85 = arith.constant 0 : index
      %c0_86 = arith.constant 0 : index
      %c0_87 = arith.constant 0 : index
      %138 = vector.load %arg2[%c0_85, %c0_86, %c0_87] : memref<1x8x128xf32, #tpu.memory_space<vmem>>, vector<1x8x128xf32>
      %139 = vector.shape_cast %138 : vector<1x8x128xf32> to vector<8x128xf32>
      %c0_88 = arith.constant 0 : index
      %c0_89 = arith.constant 0 : index
      %140 = vector.load %arg17[%c0_88, %c0_89] : memref<8x128xf32, #tpu.memory_space<vmem>>, vector<8x128xf32>
      tpu.vector_store %arg17[%c0_88, %c0_89], %139 {strides = array<i32>} : memref<8x128xf32, #tpu.memory_space<vmem>>, vector<8x128xf32>,
    } else {
    }
    %c0 = arith.constant 0 : index
    %c0_1 = arith.constant 0 : index
    %3 = vector.load %arg17[%c0, %c0_1] : memref<8x128xf32, #tpu.memory_space<vmem>>, vector<8x128xf32>
    %4 = arith.truncf %3 : vector<8x128xf32> to vector<8x128xbf16>
    %c0_2 = arith.constant 0 : index
    %c0_3 = arith.constant 0 : index
    %c0_4 = arith.constant 0 : index
    %5 = vector.load %arg3[%c0_2, %c0_3, %c0_4] : memref<1x1x8xf32, #tpu.memory_space<vmem>>, vector<1x1x8xf32>
    %6 = vector.shape_cast %5 : vector<1x1x8xf32> to vector<1x8xf32>
    %c0_5 = arith.constant 0 : index
    %c0_6 = arith.constant 0 : index
    %c0_7 = arith.constant 0 : index
    %c0_8 = arith.constant 0 : index
    %7 = vector.load %arg4[%c0_5, %c0_6, %c0_7, %c0_8] : memref<1x2x128x16xbf16, #tpu.memory_space<vmem>>, vector<1x1x128x16xbf16>
    %8 = vector.shape_cast %7 : vector<1x1x128x16xbf16> to vector<128x16xbf16>
    %cst = arith.constant dense<0.000000e+00> : vector<8x16xf32>
    %9 = tpu.matmul %4, %8, %cst {dimension_numbers = #tpu.dot_dimension_numbers<[1], [0], [0], [1], [0, 0, 1, 1], [], []>} : vector<8x128xbf16>, vector<128x16xbf16>, vector<8x16xf32> -> vector<8x16xf32>
    %c0_9 = arith.constant 0 : index
    %c0_10 = arith.constant 0 : index
    %c0_11 = arith.constant 0 : index
    %c0_12 = arith.constant 0 : index
    %10 = vector.load %arg5[%c0_9, %c0_10, %c0_11, %c0_12] : memref<1x2x128x16xbf16, #tpu.memory_space<vmem>>, vector<1x1x128x16xbf16>
    %11 = vector.shape_cast %10 : vector<1x1x128x16xbf16> to vector<128x16xbf16>
    %cst_13 = arith.constant dense<0.000000e+00> : vector<8x16xf32>
    %12 = tpu.matmul %4, %11, %cst_13 {dimension_numbers = #tpu.dot_dimension_numbers<[1], [0], [0], [1], [0, 0, 1, 1], [], []>} : vector<8x128xbf16>, vector<128x16xbf16>, vector<8x16xf32> -> vector<8x16xf32>
    %c0_14 = arith.constant 0 : index
    %c0_15 = arith.constant 0 : index
    %c0_16 = arith.constant 0 : index
    %c0_17 = arith.constant 0 : index
    %13 = vector.load %arg6[%c0_14, %c0_15, %c0_16, %c0_17] : memref<1x2x128x16xbf16, #tpu.memory_space<vmem>>, vector<1x1x128x16xbf16>
    %14 = vector.shape_cast %13 : vector<1x1x128x16xbf16> to vector<128x16xbf16>
    %cst_18 = arith.constant dense<0.000000e+00> : vector<8x16xf32>
    %15 = tpu.matmul %4, %14, %cst_18 {dimension_numbers = #tpu.dot_dimension_numbers<[1], [0], [0], [1], [0, 0, 1, 1], [], []>} : vector<8x128xbf16>, vector<128x16xbf16>, vector<8x16xf32> -> vector<8x16xf32>
    %c0_19 = arith.constant 0 : index
    %c1 = arith.constant 1 : index
    %c0_20 = arith.constant 0 : index
    %c0_21 = arith.constant 0 : index
    %16 = vector.load %arg4[%c0_19, %c1, %c0_20, %c0_21] : memref<1x2x128x16xbf16, #tpu.memory_space<vmem>>, vector<1x1x128x16xbf16>
    %17 = vector.shape_cast %16 : vector<1x1x128x16xbf16> to vector<128x16xbf16>
    %cst_22 = arith.constant dense<0.000000e+00> : vector<8x16xf32>
    %18 = tpu.matmul %4, %17, %cst_22 {dimension_numbers = #tpu.dot_dimension_numbers<[1], [0], [0], [1], [0, 0, 1, 1], [], []>} : vector<8x128xbf16>, vector<128x16xbf16>, vector<8x16xf32> -> vector<8x16xf32>
    %c0_23 = arith.constant 0 : index
    %c1_24 = arith.constant 1 : index
    %c0_25 = arith.constant 0 : index
    %c0_26 = arith.constant 0 : index
    %19 = vector.load %arg5[%c0_23, %c1_24, %c0_25, %c0_26] : memref<1x2x128x16xbf16, #tpu.memory_space<vmem>>, vector<1x1x128x16xbf16>
    %20 = vector.shape_cast %19 : vector<1x1x128x16xbf16> to vector<128x16xbf16>
    %cst_27 = arith.constant dense<0.000000e+00> : vector<8x16xf32>
    %21 = tpu.matmul %4, %20, %cst_27 {dimension_numbers = #tpu.dot_dimension_numbers<[1], [0], [0], [1], [0, 0, 1, 1], [], []>} : vector<8x128xbf16>, vector<128x16xbf16>, vector<8x16xf32> -> vector<8x16xf32>
    %c0_28 = arith.constant 0 : index
    %c1_29 = arith.constant 1 : index
    %c0_30 = arith.constant 0 : index
    %c0_31 = arith.constant 0 : index
    %22 = vector.load %arg6[%c0_28, %c1_29, %c0_30, %c0_31] : memref<1x2x128x16xbf16, #tpu.memory_space<vmem>>, vector<1x1x128x16xbf16>
    %23 = vector.shape_cast %22 : vector<1x1x128x16xbf16> to vector<128x16xbf16>
    %cst_32 = arith.constant dense<0.000000e+00> : vector<8x16xf32>
    %24 = tpu.matmul %4, %23, %cst_32 {dimension_numbers = #tpu.dot_dimension_numbers<[1], [0], [0], [1], [0, 0, 1, 1], [], []>} : vector<8x128xbf16>, vector<128x16xbf16>, vector<8x16xf32> -> vector<8x16xf32>
    %25 = vector.shape_cast %9 : vector<8x16xf32> to vector<1x8x16xf32>
    %26 = vector.shape_cast %18 : vector<8x16xf32> to vector<1x8x16xf32>
    %27 = tpu.concatenate %25, %26 in 0 : vector<1x8x16xf32>, vector<1x8x16xf32> -> vector<2x8x16xf32>
    %28 = arith.truncf %27 : vector<2x8x16xf32> to vector<2x8x16xbf16>
    %29 = vector.shape_cast %12 : vector<8x16xf32> to vector<1x8x16xf32>
    %30 = vector.shape_cast %21 : vector<8x16xf32> to vector<1x8x16xf32>
    %31 = tpu.concatenate %29, %30 in 0 : vector<1x8x16xf32>, vector<1x8x16xf32> -> vector<2x8x16xf32>
    %32 = arith.truncf %31 : vector<2x8x16xf32> to vector<2x8x16xbf16>
    %33 = vector.shape_cast %15 : vector<8x16xf32> to vector<1x8x16xf32>
    %34 = vector.shape_cast %24 : vector<8x16xf32> to vector<1x8x16xf32>
    %35 = tpu.concatenate %33, %34 in 0 : vector<1x8x16xf32>, vector<1x8x16xf32> -> vector<2x8x16xf32>
    %36 = arith.truncf %35 : vector<2x8x16xf32> to vector<2x8x16xbf16>
    "tpu.trace_start"() <{level = 10 : i32, message = "hlk,hmk->hlm"}> : () -> ()
    %cst_33 = arith.constant dense<0.000000e+00> : vector<2x8x8xf32>
    %37 = tpu.matmul %28, %32, %cst_33 {dimension_numbers = #tpu.dot_dimension_numbers<[2], [2], [1], [1], [0, 0, 0, 1, 1, 1], [0], [0]>} : vector<2x8x16xbf16>, vector<2x8x16xbf16>, vector<2x8x8xf32> -> vector<2x8x8xf32>
    "tpu.trace_stop"() : () -> ()
    %38 = vector.shape_cast %6 : vector<1x8xf32> to vector<1x1x8xf32>
    %39 = vector.broadcast %38 : vector<1x1x8xf32> to vector<2x8x8xf32>
    %40 = arith.addf %37, %39 : vector<2x8x8xf32>
    %cst_34 = arith.constant dense<0xFF800000> : vector<2x8xf32>
    %41 = vector.multi_reduction <maximumf>, %40, %cst_34 [2] : vector<2x8x8xf32> to vector<2x8xf32>
    %42 = vector.shape_cast %41 : vector<2x8xf32> to vector<2x8x1xf32>
    %43 = vector.broadcast %42 : vector<2x8x1xf32> to vector<2x8x8xf32>
    %44 = arith.subf %40, %43 : vector<2x8x8xf32>
    %45 = math.exp %44 : vector<2x8x8xf32>
    %cst_35 = arith.constant dense<0.000000e+00> : vector<2x8xf32>
    %46 = vector.multi_reduction <add>, %45, %cst_35 [2] : vector<2x8x8xf32> to vector<2x8xf32>
    %47 = vector.shape_cast %46 : vector<2x8xf32> to vector<2x8x1xf32>
    %48 = tpu.reciprocal %47 {approx = true} : vector<2x8x1xf32> -> vector<2x8x1xf32>
    %49 = vector.broadcast %48 : vector<2x8x1xf32> to vector<2x8x8xf32>
    %50 = arith.mulf %45, %49 : vector<2x8x8xf32>
    %51 = arith.truncf %50 : vector<2x8x8xf32> to vector<2x8x8xbf16>
    "tpu.trace_start"() <{level = 10 : i32, message = "hlm,hmv->hlv"}> : () -> ()
    %cst_36 = arith.constant dense<0.000000e+00> : vector<2x8x16xf32>
    %52 = tpu.matmul %51, %36, %cst_36 {dimension_numbers = #tpu.dot_dimension_numbers<[2], [1], [1], [2], [0, 0, 0, 1, 1, 2], [0], [0]>} : vector<2x8x8xbf16>, vector<2x8x16xbf16>, vector<2x8x16xf32> -> vector<2x8x16xf32>
    "tpu.trace_stop"() : () -> ()
    %53 = arith.truncf %52 : vector<2x8x16xf32> to vector<2x8x16xbf16>
    %c0_37 = arith.constant 0 : index
    %c0_38 = arith.constant 0 : index
    %c0_39 = arith.constant 0 : index
    %c0_40 = arith.constant 0 : index
    %54 = vector.load %arg7[%c0_37, %c0_38, %c0_39, %c0_40] : memref<1x2x16x128xbf16, #tpu.memory_space<vmem>>, vector<1x2x16x128xbf16>
    %55 = vector.shape_cast %54 : vector<1x2x16x128xbf16> to vector<2x16x128xbf16>
    "tpu.trace_start"() <{level = 10 : i32, message = "hlv,hvd->hld"}> : () -> ()
    %cst_41 = arith.constant dense<0.000000e+00> : vector<2x8x128xf32>
    %56 = tpu.matmul %53, %55, %cst_41 {dimension_numbers = #tpu.dot_dimension_numbers<[2], [1], [1], [2], [0, 0, 0, 1, 1, 2], [0], [0]>} : vector<2x8x16xbf16>, vector<2x16x128xbf16>, vector<2x8x128xf32> -> vector<2x8x128xf32>
    "tpu.trace_stop"() : () -> ()
    %cst_42 = arith.constant dense<0.000000e+00> : vector<8x128xf32>
    %57 = vector.multi_reduction <add>, %56, %cst_42 [0] : vector<2x8x128xf32> to vector<8x128xf32>
    %58 = arith.addf %57, %3 : vector<8x128xf32>
    %c0_43 = arith.constant 0 : index
    %c0_44 = arith.constant 0 : index
    %c0_45 = arith.constant 0 : index
    %59 = vector.load %arg8[%c0_43, %c0_44, %c0_45] : memref<1x1x128xf32, #tpu.memory_space<vmem>>, vector<1x1x128xf32>
    %60 = vector.shape_cast %59 : vector<1x1x128xf32> to vector<1x128xf32>
    %c0_46 = arith.constant 0 : index
    %c0_47 = arith.constant 0 : index
    %c0_48 = arith.constant 0 : index
    %61 = vector.load %arg9[%c0_46, %c0_47, %c0_48] : memref<1x1x128xf32, #tpu.memory_space<vmem>>, vector<1x1x128xf32>
    %62 = vector.shape_cast %61 : vector<1x1x128xf32> to vector<1x128xf32>
    %cst_49 = arith.constant dense<0.000000e+00> : vector<8xf32>
    %63 = vector.multi_reduction <add>, %58, %cst_49 [1] : vector<8x128xf32> to vector<8xf32>
    %64 = vector.shape_cast %63 : vector<8xf32> to vector<8x1xf32>
    %cst_50 = arith.constant 3.125000e-02 : f32
    %65 = vector.broadcast %cst_50 : f32 to vector<8x1xf32>
    %66 = arith.mulf %64, %65 : vector<8x1xf32>
    %67 = arith.mulf %58, %58 : vector<8x128xf32>
    %cst_51 = arith.constant dense<0.000000e+00> : vector<8xf32>
    %68 = vector.multi_reduction <add>, %67, %cst_51 [1] : vector<8x128xf32> to vector<8xf32>
    %69 = vector.shape_cast %68 : vector<8xf32> to vector<8x1xf32>
    %cst_52 = arith.constant 3.125000e-02 : f32
    %70 = vector.broadcast %cst_52 : f32 to vector<8x1xf32>
    %71 = arith.mulf %69, %70 : vector<8x1xf32>
    %72 = arith.mulf %66, %66 : vector<8x1xf32>
    %73 = arith.subf %71, %72 : vector<8x1xf32>
    %cst_53 = arith.constant 0.000000e+00 : f32
    %74 = vector.broadcast %cst_53 : f32 to vector<8x1xf32>
    %75 = arith.maximumf %73, %74 : vector<8x1xf32>
    %76 = vector.broadcast %66 : vector<8x1xf32> to vector<8x128xf32>
    %77 = arith.subf %58, %76 : vector<8x128xf32>
    %cst_54 = arith.constant 9.99999997E-7 : f32
    %78 = vector.broadcast %cst_54 : f32 to vector<8x1xf32>
    %79 = arith.addf %75, %78 : vector<8x1xf32>
    %80 = math.rsqrt %79 : vector<8x1xf32>
    %81 = vector.broadcast %80 : vector<8x1xf32> to vector<8x128xf32>
    %82 = arith.mulf %77, %81 : vector<8x128xf32>
    %83 = vector.broadcast %60 : vector<1x128xf32> to vector<8x128xf32>
    %84 = arith.mulf %82, %83 : vector<8x128xf32>
    %85 = vector.broadcast %62 : vector<1x128xf32> to vector<8x128xf32>
    %86 = arith.addf %84, %85 : vector<8x128xf32>
    %87 = arith.truncf %86 : vector<8x128xf32> to vector<8x128xbf16>
    %c0_55 = arith.constant 0 : index
    %c0_56 = arith.constant 0 : index
    %c0_57 = arith.constant 0 : index
    %88 = vector.load %arg10[%c0_55, %c0_56, %c0_57] : memref<1x128x128xbf16, #tpu.memory_space<vmem>>, vector<1x128x128xbf16>
    %89 = vector.shape_cast %88 : vector<1x128x128xbf16> to vector<128x128xbf16>
    %cst_58 = arith.constant dense<0.000000e+00> : vector<8x128xf32>
    %90 = tpu.matmul %87, %89, %cst_58 {dimension_numbers = #tpu.dot_dimension_numbers<[1], [0], [0], [1], [0, 0, 1, 1], [], []>} : vector<8x128xbf16>, vector<128x128xbf16>, vector<8x128xf32> -> vector<8x128xf32>
    %c0_59 = arith.constant 0 : index
    %c0_60 = arith.constant 0 : index
    %c0_61 = arith.constant 0 : index
    %91 = vector.load %arg11[%c0_59, %c0_60, %c0_61] : memref<1x1x128xf32, #tpu.memory_space<vmem>>, vector<1x1x128xf32>
    %92 = vector.shape_cast %91 : vector<1x1x128xf32> to vector<1x128xf32>
    %93 = vector.broadcast %92 : vector<1x128xf32> to vector<8x128xf32>
    %94 = arith.addf %90, %93 : vector<8x128xf32>
    %cst_62 = arith.constant 0.000000e+00 : f32
    %95 = vector.broadcast %cst_62 : f32 to vector<8x128xf32>
    %96 = arith.maximumf %94, %95 : vector<8x128xf32>
    %97 = arith.truncf %96 : vector<8x128xf32> to vector<8x128xbf16>
    %c0_63 = arith.constant 0 : index
    %c0_64 = arith.constant 0 : index
    %c0_65 = arith.constant 0 : index
    %98 = vector.load %arg12[%c0_63, %c0_64, %c0_65] : memref<1x128x128xbf16, #tpu.memory_space<vmem>>, vector<1x128x128xbf16>
    %99 = vector.shape_cast %98 : vector<1x128x128xbf16> to vector<128x128xbf16>
    %cst_66 = arith.constant dense<0.000000e+00> : vector<8x128xf32>
    %100 = tpu.matmul %97, %99, %cst_66 {dimension_numbers = #tpu.dot_dimension_numbers<[1], [0], [0], [1], [0, 0, 1, 1], [], []>} : vector<8x128xbf16>, vector<128x128xbf16>, vector<8x128xf32> -> vector<8x128xf32>
    %c0_67 = arith.constant 0 : index
    %c0_68 = arith.constant 0 : index
    %c0_69 = arith.constant 0 : index
    %101 = vector.load %arg13[%c0_67, %c0_68, %c0_69] : memref<1x1x128xf32, #tpu.memory_space<vmem>>, vector<1x1x128xf32>
    %102 = vector.shape_cast %101 : vector<1x1x128xf32> to vector<1x128xf32>
    %103 = vector.broadcast %102 : vector<1x128xf32> to vector<8x128xf32>
    %104 = arith.addf %100, %103 : vector<8x128xf32>
    %105 = arith.addf %104, %86 : vector<8x128xf32>
    %c0_70 = arith.constant 0 : index
    %c0_71 = arith.constant 0 : index
    %c0_72 = arith.constant 0 : index
    %106 = vector.load %arg14[%c0_70, %c0_71, %c0_72] : memref<1x1x128xf32, #tpu.memory_space<vmem>>, vector<1x1x128xf32>
    %107 = vector.shape_cast %106 : vector<1x1x128xf32> to vector<1x128xf32>
    %c0_73 = arith.constant 0 : index
    %c0_74 = arith.constant 0 : index
    %c0_75 = arith.constant 0 : index
    %108 = vector.load %arg15[%c0_73, %c0_74, %c0_75] : memref<1x1x128xf32, #tpu.memory_space<vmem>>, vector<1x1x128xf32>
    %109 = vector.shape_cast %108 : vector<1x1x128xf32> to vector<1x128xf32>
    %cst_76 = arith.constant dense<0.000000e+00> : vector<8xf32>
    %110 = vector.multi_reduction <add>, %105, %cst_76 [1] : vector<8x128xf32> to vector<8xf32>
    %111 = vector.shape_cast %110 : vector<8xf32> to vector<8x1xf32>
    %cst_77 = arith.constant 3.125000e-02 : f32
    %112 = vector.broadcast %cst_77 : f32 to vector<8x1xf32>
    %113 = arith.mulf %111, %112 : vector<8x1xf32>
    %114 = arith.mulf %105, %105 : vector<8x128xf32>
    %cst_78 = arith.constant dense<0.000000e+00> : vector<8xf32>
    %115 = vector.multi_reduction <add>, %114, %cst_78 [1] : vector<8x128xf32> to vector<8xf32>
    %116 = vector.shape_cast %115 : vector<8xf32> to vector<8x1xf32>
    %cst_79 = arith.constant 3.125000e-02 : f32
    %117 = vector.broadcast %cst_79 : f32 to vector<8x1xf32>
    %118 = arith.mulf %116, %117 : vector<8x1xf32>
    %119 = arith.mulf %113, %113 : vector<8x1xf32>
    %120 = arith.subf %118, %119 : vector<8x1xf32>
    %cst_80 = arith.constant 0.000000e+00 : f32
    %121 = vector.broadcast %cst_80 : f32 to vector<8x1xf32>
    %122 = arith.maximumf %120, %121 : vector<8x1xf32>
    %123 = vector.broadcast %113 : vector<8x1xf32> to vector<8x128xf32>
    %124 = arith.subf %105, %123 : vector<8x128xf32>
    %cst_81 = arith.constant 9.99999997E-7 : f32
    %125 = vector.broadcast %cst_81 : f32 to vector<8x1xf32>
    %126 = arith.addf %122, %125 : vector<8x1xf32>
    %127 = math.rsqrt %126 : vector<8x1xf32>
    %128 = vector.broadcast %127 : vector<8x1xf32> to vector<8x128xf32>
    %129 = arith.mulf %124, %128 : vector<8x128xf32>
    %130 = vector.broadcast %107 : vector<1x128xf32> to vector<8x128xf32>
    %131 = arith.mulf %129, %130 : vector<8x128xf32>
    %132 = vector.broadcast %109 : vector<1x128xf32> to vector<8x128xf32>
    %133 = arith.addf %131, %132 : vector<8x128xf32>
    %c0_82 = arith.constant 0 : index
    %c0_83 = arith.constant 0 : index
    %134 = vector.load %arg17[%c0_82, %c0_83] : memref<8x128xf32, #tpu.memory_space<vmem>>, vector<8x128xf32>
    tpu.vector_store %arg17[%c0_82, %c0_83], %133 {strides = array<i32>} : memref<8x128xf32, #tpu.memory_space<vmem>>, vector<8x128xf32>,
    %c1_i32 = arith.constant 1 : i32
    %135 = arith.cmpi eq, %arg1, %c1_i32 : i32
    %136 = arith.extui %135 : i1 to i32
    %c0_i32_84 = arith.constant 0 : i32
    %137 = arith.cmpi ne, %136, %c0_i32_84 : i32
    scf.if %137 {
      %c0_85 = arith.constant 0 : index
      %c0_86 = arith.constant 0 : index
      %c0_87 = arith.constant 0 : index
      %138 = vector.load %arg16[%c0_85, %c0_86, %c0_87] : memref<1x8x128xf32, #tpu.memory_space<vmem>>, vector<1x8x128xf32>
      %139 = vector.shape_cast %138 : vector<1x8x128xf32> to vector<8x128xf32>
      %140 = vector.shape_cast %133 : vector<8x128xf32> to vector<1x8x128xf32>
      tpu.vector_store %arg16[%c0_85, %c0_86, %c0_87], %140 {strides = array<i32>} : memref<1x8x128xf32, #tpu.memory_space<vmem>>, vector<1x8x128xf32>,
    } else {
    }
    return
  }
  func.func @transform_0(%arg0: i32, %arg1: i32) -> (i32, i32, i32) {
    %c0_i32 = arith.constant 0 : i32
    %c0_i32_0 = arith.constant 0 : i32
    %c0_i32_1 = arith.constant 0 : i32
    return %arg0, %c0_i32, %c0_i32_0 : i32, i32, i32
  }
  func.func @transform_1(%arg0: i32, %arg1: i32) -> (i32, i32, i32) {
    %c0_i32 = arith.constant 0 : i32
    %c0_i32_0 = arith.constant 0 : i32
    %c0_i32_1 = arith.constant 0 : i32
    return %arg0, %c0_i32, %c0_i32_0 : i32, i32, i32
  }
  func.func @transform_2(%arg0: i32, %arg1: i32) -> (i32, i32, i32, i32) {
    %c0_i32 = arith.constant 0 : i32
    %c0_i32_0 = arith.constant 0 : i32
    %c0_i32_1 = arith.constant 0 : i32
    %c0_i32_2 = arith.constant 0 : i32
    return %arg1, %c0_i32, %c0_i32_0, %c0_i32_1 : i32, i32, i32, i32
  }
  func.func @transform_3(%arg0: i32, %arg1: i32) -> (i32, i32, i32, i32) {
    %c0_i32 = arith.constant 0 : i32
    %c0_i32_0 = arith.constant 0 : i32
    %c0_i32_1 = arith.constant 0 : i32
    %c0_i32_2 = arith.constant 0 : i32
    return %arg1, %c0_i32, %c0_i32_0, %c0_i32_1 : i32, i32, i32, i32
  }
  func.func @transform_4(%arg0: i32, %arg1: i32) -> (i32, i32, i32, i32) {
    %c0_i32 = arith.constant 0 : i32
    %c0_i32_0 = arith.constant 0 : i32
    %c0_i32_1 = arith.constant 0 : i32
    %c0_i32_2 = arith.constant 0 : i32
    return %arg1, %c0_i32, %c0_i32_0, %c0_i32_1 : i32, i32, i32, i32
  }
  func.func @transform_5(%arg0: i32, %arg1: i32) -> (i32, i32, i32, i32) {
    %c0_i32 = arith.constant 0 : i32
    %c0_i32_0 = arith.constant 0 : i32
    %c0_i32_1 = arith.constant 0 : i32
    %c0_i32_2 = arith.constant 0 : i32
    return %arg1, %c0_i32, %c0_i32_0, %c0_i32_1 : i32, i32, i32, i32
  }
  func.func @transform_6(%arg0: i32, %arg1: i32) -> (i32, i32, i32) {
    %c0_i32 = arith.constant 0 : i32
    %c0_i32_0 = arith.constant 0 : i32
    %c0_i32_1 = arith.constant 0 : i32
    return %arg1, %c0_i32, %c0_i32_0 : i32, i32, i32
  }
  func.func @transform_7(%arg0: i32, %arg1: i32) -> (i32, i32, i32) {
    %c0_i32 = arith.constant 0 : i32
    %c0_i32_0 = arith.constant 0 : i32
    %c0_i32_1 = arith.constant 0 : i32
    return %arg1, %c0_i32, %c0_i32_0 : i32, i32, i32
  }
  func.func @transform_8(%arg0: i32, %arg1: i32) -> (i32, i32, i32) {
    %c0_i32 = arith.constant 0 : i32
    %c0_i32_0 = arith.constant 0 : i32
    %c0_i32_1 = arith.constant 0 : i32
    return %arg1, %c0_i32, %c0_i32_0 : i32, i32, i32
  }
  func.func @transform_9(%arg0: i32, %arg1: i32) -> (i32, i32, i32) {
    %c0_i32 = arith.constant 0 : i32
    %c0_i32_0 = arith.constant 0 : i32
    %c0_i32_1 = arith.constant 0 : i32
    return %arg1, %c0_i32, %c0_i32_0 : i32, i32, i32
  }
  func.func @transform_10(%arg0: i32, %arg1: i32) -> (i32, i32, i32) {
    %c0_i32 = arith.constant 0 : i32
    %c0_i32_0 = arith.constant 0 : i32
    %c0_i32_1 = arith.constant 0 : i32
    return %arg1, %c0_i32, %c0_i32_0 : i32, i32, i32
  }
  func.func @transform_11(%arg0: i32, %arg1: i32) -> (i32, i32, i32) {
    %c0_i32 = arith.constant 0 : i32
    %c0_i32_0 = arith.constant 0 : i32
    %c0_i32_1 = arith.constant 0 : i32
    return %arg1, %c0_i32, %c0_i32_0 : i32, i32, i32
  }
  func.func @transform_12(%arg0: i32, %arg1: i32) -> (i32, i32, i32) {
    %c0_i32 = arith.constant 0 : i32
    %c0_i32_0 = arith.constant 0 : i32
    %c0_i32_1 = arith.constant 0 : i32
    return %arg1, %c0_i32, %c0_i32_0 : i32, i32, i32
  }
  func.func @transform_13(%arg0: i32, %arg1: i32) -> (i32, i32, i32) {
    %c0_i32 = arith.constant 0 : i32
    %c0_i32_0 = arith.constant 0 : i32
    %c0_i32_1 = arith.constant 0 : i32
    return %arg1, %c0_i32, %c0_i32_0 : i32, i32, i32
  }
  func.func @transform_14(%arg0: i32, %arg1: i32) -> (i32, i32, i32) {
    %c0_i32 = arith.constant 0 : i32
    %c0_i32_0 = arith.constant 0 : i32
    %c0_i32_1 = arith.constant 0 : i32
    return %arg0, %c0_i32, %c0_i32_0 : i32, i32, i32
  }
}

</mosaic_0001>

<bundles_post_ra>
// kernel: tpu_custom_call.1
= control target key start
LH: loop header
LB: loop body
LE: loop exit
PB: predicated region body
PF: predicated region fallthrough
CT: control target
= control target key end

     0   :  { %s3357_s0 = inlined_call_operand.vmem [shape: f32[2,8,128], index: 0, kind: input, shape index: {}]   ;;  %s3358_s1 = inlined_call_operand.vmem [shape: f32[2,1,8], index: 1, kind: input, shape index: {}]   ;;  %s3359_s2 = inlined_call_operand.vmem [shape: bf16[2,2,128,16], index: 2, kind: input, shape index: {}]   ;;  %s3360_s3 = inlined_call_operand.vmem [shape: bf16[2,2,128,16], index: 3, kind: input, shape index: {}]   ;;  %s3361_s4 = inlined_call_operand.vmem [shape: bf16[2,2,128,16], index: 4, kind: input, shape index: {}]   ;;  %s3362_s5 = inlined_call_operand.vmem [shape: bf16[2,2,16,128], index: 5, kind: input, shape index: {}]   ;;  %s3363_s6 = inlined_call_operand.vmem [shape: f32[2,1,128], index: 6, kind: input, shape index: {}]   ;;  %s3364_s7 = inlined_call_operand.vmem [shape: f32[2,1,128], index: 7, kind: input, shape index: {}]   ;;  %s3365_s8 = inlined_call_operand.vmem [shape: bf16[2,128,128], index: 8, kind: input, shape index: {}]   ;;  %s3366_s9 = inlined_call_operand.vmem [shape: f32[2,1,128], index: 9, kind: input, shape index: {}]   ;;  %s3367_s10 = inlined_call_operand.vmem [shape: bf16[2,128,128], index: 10, kind: input, shape index: {}]   ;;  %s3368_s11 = inlined_call_operand.vmem [shape: f32[2,1,128], index: 11, kind: input, shape index: {}]   ;;  %s3369_s12 = inlined_call_operand.vmem [shape: f32[2,1,128], index: 12, kind: input, shape index: {}]   ;;  %s3370_s13 = inlined_call_operand.vmem [shape: f32[2,1,128], index: 13, kind: input, shape index: {}]   ;;  %s3371_s14 = inlined_call_operand.hbm [shape: f32[2,8,128], index: 14, kind: output, shape index: {}]  }
   0x1   :  { %3389 = sst [smem:[#allocation21_spill]] %s3357_s0 }
   0x2   :  { %3390 = sst [smem:[#allocation22_spill]] %s3358_s1 }
   0x3   :  { %3391 = sst [smem:[#allocation23_spill]] %s3359_s2 }
   0x4   :  { %3392 = sst [smem:[#allocation24_spill]] %s3360_s3 }
   0x5   :  { %3393 = sst [smem:[#allocation25_spill]] %s3361_s4 }
   0x6   :  { %3394 = sst [smem:[#allocation26_spill]] %s3362_s5 }
   0x7   :  { %3395 = sst [smem:[#allocation27_spill]] %s3365_s8 }
   0x8   :  { %3396 = sst [smem:[#allocation28_spill]] %s3371_s14 }
   0x9   :  { %19 = vsyncpa [#allocation4], 0 }
   0xa   :  { %21 = vsyncpa [#allocation4 + $0x1], 0  ;;  %s2931_s29 = smov 0   ;;  %s2933_s30 = smov 0  }
   0xb   :  { %s2935_s15 = smov 0   ;;  %s2937_s16 = smov 0  }
   0xc   :  { %s2939_s17 = smov 0   ;;  %s2941_s18 = smov 0  }
   0xd   :  { %s2943_s19 = smov 0   ;;  %s2945_s20 = smov 0  }
   0xe LB: > { %3397 = sst [smem:[#allocation6_spill]] %s2823_s29  ;;  %s2170_s21 = sadd.s32 4294967295, %s2851_s20   ;;  %s2851_s20 = sphi %s2945_s20, %s27_s20   ;;  %s2847_s19 = sphi %s2943_s19, %s3444_s19   ;;  %s2843_s18 = sphi %s2941_s18, %s3443_s18   ;;  %s2839_s17 = sphi %s2939_s17, %s3442_s17   ;;  %s2835_s16 = sphi %s2937_s16, %s3441_s16   ;;  %s2831_s15 = sphi %s2935_s15, %s3440_s15   ;;  %s2827_s30 = sphi %s2933_s30, %s3439_s30   ;;  %s2823_s29 = sphi %s2931_s29, %s3438_s29  }
   0xf   : > { %3398 = sst [smem:[#allocation7_spill]] %s2827_s30  ;;  %s2171_s22 = sadd.s32 4294967294, %s2851_s20  }
  0x10   : > { %3399 = sst [smem:[#allocation8_spill]] %s2831_s15  ;;  %s36_s23 = sadd.s32 1, %s2843_s18 }
  0x11   : > { %3400 = sst [smem:[#allocation9_spill]] %s2835_s16  ;;  %p37_p0 = scmp.ge.s32.totalorder %s36_s23, 2 }
  0x12   : > { %3401 = sst [smem:[#allocation10_spill]] %s2839_s17  ;;  %s39_s24 = sadd.s32 1, %s2847_s19 }
  0x13   : > { %3402 = sst [smem:[#allocation11_spill]] %s2843_s18  ;;  %p420_p1 = scmp.ne.s32.totalorder %s2831_s15, %s2827_s30 }
  0x14   : > { %3403 = sst [smem:[#allocation12_spill]] %s2847_s19  ;;  %p421_p2 = scmp.eq.s32.totalorder %s2170_s21, 3 }
  0x15   : > { %3404 = sst [smem:[#allocation13_spill]] %s2851_s20  ;;  %s3446_s23 = smov (%p37_p0, %s36_s23), 0 }
  0x16   : > { %3405 = sst [smem:[#allocation14_spill]] %s3446_s23  ;;  %s3448_s24 = smov (!%p37_p0, %s39_s24), %s2847_s19 }
  0x17   : > { %p2980_p3 = por %p421_p2, %p420_p1  ;;  %p426_p4 = scmp.ne.s32.totalorder %s2827_s30, %s2823_s29 }
  0x18   : > { %p41_p5 = scmp.ge.s32.totalorder %s3448_s24, 2  ;;  %p427_p6 = scmp.eq.s32.totalorder %s2171_s22, 3 }
  0x19   : > { %s3406_s25 = scalar_select %p2980_p3, 1, 0 }
  0x1a   : > { %p2174_p7 = scmp.ge.s32.totalorder %s2851_s20, 1  ;;  %p542_p8 = scmp.lt.s32.totalorder %s2851_s20, 5 }
  0x1b   : > { %3407 = sst [smem:[#allocation15_spill]] %s3406_s25  ;;  %s3450_s24 = smov (%p41_p5, %s3448_s24), 0 }
  0x1c   : > { %3408 = sst [smem:[#allocation16_spill]] %s3450_s24  ;;  %p2990_p9 = por %p427_p6, %p426_p4 }
  0x1d   : > { %p543_p10 = pnand %p2174_p7, %p542_p8  ;;  %s407_s27 = ssub.s32 %s2847_s19, %s3450_s24 }
  0x1e   : > { %s3409_s26 = scalar_select %p2990_p9, 1, 0 }
  0x1f   : > { %s410_s28 = sadd.s32 1, %s2831_s15  ;;  %p408_p11 = scmp.eq.s32.totalorder %s407_s27, 0 }
  0x20   : > { %3410 = sst [smem:[#allocation17_spill]] %s3409_s26  ;;  %546 = sbr.rel (%p543_p10) target bundleno = 2025 (0x7e9), region = 76 }
  0x21   : > { %s2998_s21 = scalar_select %p408_p11, %s2831_s15, %s410_s28  }
  0x23   : > { %3411 = sst [smem:[#allocation18_spill]] %s2998_s21 }
  0x25   : > { %s3375_s22 = sand.u32 1, %s2827_s30   ;;  %p638_p12 = scmp.lt.s32.totalorder %s2839_s17, 1 }
  0x26   : > { %s3004_s23 = sshll.u32 %s3375_s22, 3  ;;  %p645_p13 = scmp.lt.s32.totalorder %s2835_s16, 1 }
  0x27   : > { %s3008_s18 = scalar_select %p638_p12, %s2839_s17, 1 }
  0x28   : > { %s3011_s27 = scalar_select %p645_p13, %s2835_s16, 1 }
  0x29   : > { %3412 = sst [smem:[#allocation19_spill]] %s3008_s18  ;;  %s2176_s28 = sshll.u32 %s3008_s18, 3 }
  0x2a   : > { %s3414_s0 = sld [smem:[#allocation21_spill]]  ;;  %s2322_s29 = sshll.u32 %s3011_s27, 7 }
  0x2b   : > { %s3415_s2 = sld [smem:[#allocation23_spill]]  ;;  %s2325_s15 = sshll.u32 %s3011_s27, 4 }
  0x2c   : > { %s3416_s3 = sld [smem:[#allocation24_spill]]  ;;  %s2326_s17 = sshll.u32 %s3011_s27, 6 }
  0x2d   : > { %s3418_s4 = sld [smem:[#allocation25_spill]]  ;;  %s678_s21 = scalar_lea.vmem %s3366_s9, %s3011_s27 }
  0x2e   : > { %s3419_s5 = sld [smem:[#allocation26_spill]]  ;;  %s689_s20 = scalar_lea.vmem %s3369_s12, %s3011_s27 }
  0x2f   : > { %s3420_s8 = sld [smem:[#allocation27_spill]] }
  0x30   : > { %s641_s26 = scalar_lea.vmem %s3414_s0, %s2176_s28  ;;  %s3421_s19 = sld [smem:[#allocation9_spill]] }
  0x31   : > { %s3025_s25 = scalar_lea.vmem %s3415_s2, %s2322_s29  ;;  %s686_s2 = scalar_lea.vmem %s3368_s11, %s3011_s27 }
  0x32   : > { %s3030_s16 = scalar_lea.vmem %s3416_s3, %s2322_s29 }
  0x33   : > { %3417 = sst [smem:[#allocation20_spill]] %s3030_s16  ;;  %s3035_s22 = scalar_lea.vmem %s3418_s4, %s2322_s29 }
  0x34   : > { %s3041_s0 = scalar_lea.vmem %s3419_s5, %s2325_s15  ;;  %s3064_s4 = scalar_lea.vmem %s3367_s10, %s2326_s17 }
  0x35   : > { %s3055_s29 = scalar_lea.vmem %s3420_s8, %s2326_s17  ;;  %s692_s5 = scalar_lea.vmem %s3370_s13, %s3011_s27 }
  0x36   : > { %s637_s8 = scalar_lea.vmem [#allocation3], %s3004_s23  ;;  %p2189_p0 = scmp.ne.s32.totalorder %s3421_s19, 0 }
  0x38   : > { %697 = sbr.rel (%p2189_p0) target bundleno = 63 (0x3f), region = 80 }
  0x3d   : > { %v698_v0 = vld [vmem:[%s641_s26] sm:$0xff] }
  0x3e   : > { %699 = vst [vmem:[#allocation2] sm:$0xff] %v698_v0 }
  0x3f PF: > { %s3422_s17 = sld [smem:[#allocation20_spill]]  ;;  %v2681_v1 = vld [vmem:[%s3025_s25 + $0x38] sm:$0xff]   ;;  %v2853_v2 = vmov 0.0   ;;  %v2683_v4 = vld [vmem:[%s3025_s25 + $0x30] sm:$0xff]   ;;  %vm2854_vm0 = vmmov 0   ;;  %v2685_v6 = vld [vmem:[%s3025_s25 + $0x28] sm:$0xff]   ;;  %s3426_s15 = scalar_lea.vmem %s3363_s6, %s3011_s27 }
  0x40   : > { %2412 = vmatprep.subr.bf16.mxu0 %v2853_v2  ;;  %2432 = vmatprep.subr.bf16.mxu1 %v2853_v2  ;;  %v2687_v8 = vld [vmem:[%s3025_s25 + $0x20] sm:$0xff]   ;;  %v2689_v10 = vld [vmem:[%s3025_s25 + $0x18] sm:$0xff]   ;;  %v2691_v12 = vld [vmem:[%s3025_s25 + $0x10] sm:$0xff]   ;;  %vm1342_vm1 = vcmask 130048   ;;  %vm1463_vm2 = vcmask 1043456   ;;  %s3424_s30 = sld [smem:[#allocation22_spill]]  ;;  %s3427_s14 = scalar_lea.vmem %s3364_s7, %s3011_s27 }
  0x41   : > { %2413 = vmatpush3.bf16.msra.mxu0 %v2681_v1  ;;  %2428 = vmatprep.mubr.msk.bf16.mxu0 %vm2854_vm0, %v2853_v2  ;;  %v2693_v14 = vld [vmem:[%s3025_s25 + $0x8] sm:$0xff]   ;;  %v2695_v16 = vld [vmem:[%s3025_s25] sm:$0xff]   ;;  %v2697_v20 = vld [vmem:[%s3035_s22 + $0x38] sm:$0xff]   ;;  %vm1435_vm3 = vcmask 64512  }
  0x42   : > { %2414 = vmatprep.subr.bf16.mxu0 %v2853_v2  ;;  %2448 = vmatprep.mubr.msk.bf16.mxu1 %vm2854_vm0, %v2853_v2  ;;  %v2706_v21 = vld [vmem:[%s3025_s25 + $0x78] sm:$0xff]   ;;  %v2698_v22 = vld [vmem:[%s3035_s22 + $0x30] sm:$0xff]   ;;  %v2699_v24 = vld [vmem:[%s3035_s22 + $0x28] sm:$0xff]  }
  0x43   : > { %v2708_v23 = vld [vmem:[%s3025_s25 + $0x70] sm:$0xff]   ;;  %v2700_v25 = vld [vmem:[%s3035_s22 + $0x20] sm:$0xff]   ;;  %v2710_v26 = vld [vmem:[%s3025_s25 + $0x68] sm:$0xff]  }
  0x44   : > { %v2712_v27 = vld [vmem:[%s3025_s25 + $0x60] sm:$0xff]   ;;  %v2701_v28 = vld [vmem:[%s3035_s22 + $0x18] sm:$0xff]   ;;  %v2702_v30 = vld [vmem:[%s3035_s22 + $0x10] sm:$0xff]  }
  0x45   : > { %v2682_v3 = vld [vmem:[%s3422_s17 + $0x38] sm:$0xff]   ;;  %v2684_v5 = vld [vmem:[%s3422_s17 + $0x30] sm:$0xff]   ;;  %2415 = vmatpush3.bf16.msra.mxu0 %v2683_v4  ;;  %v2686_v7 = vld [vmem:[%s3422_s17 + $0x28] sm:$0xff]  }
  0x46   : > { %2433 = vmatpush3.bf16.msra.mxu1 %v2682_v3  ;;  %2416 = vmatprep.subr.bf16.mxu0 %v2853_v2  ;;  %v2688_v9 = vld [vmem:[%s3422_s17 + $0x20] sm:$0xff]   ;;  %v2690_v11 = vld [vmem:[%s3422_s17 + $0x18] sm:$0xff]   ;;  %v2692_v13 = vld [vmem:[%s3422_s17 + $0x10] sm:$0xff]  }
  0x47   : > { %2434 = vmatprep.subr.bf16.mxu1 %v2853_v2  ;;  %v2694_v15 = vld [vmem:[%s3422_s17 + $0x8] sm:$0xff]   ;;  %v3113_v17 = vld [vmem:[#allocation2] sm:$0xff]  ;;  %v2714_v29 = vld [vmem:[%s3025_s25 + $0x58] sm:$0xff]  }
  0x48   : > { %v2696_v18 = vld [vmem:[%s3422_s17] sm:$0xff]   ;;  %v3120_v19 = vpack.c.bf16 %v3113_v17, %v3113_v17  ;;  %v2716_v31 = vld [vmem:[%s3025_s25 + $0x50] sm:$0xff]   ;;  %v2703_v32 = vld [vmem:[%s3035_s22 + $0x8] sm:$0xff]  }
  0x49   : > { %2417 = vmatpush3.bf16.msra.mxu0 %v2685_v6  ;;  %v2718_v33 = vld [vmem:[%s3025_s25 + $0x48] sm:$0xff]   ;;  %v2704_v34 = vld [vmem:[%s3035_s22] sm:$0xff]   ;;  %v2705_v36 = vld [vmem:[%s3422_s17 + $0x78] sm:$0xff]  }
  0x4a   : > { %2435 = vmatpush3.bf16.msra.mxu1 %v2684_v5  ;;  %2418 = vmatprep.subr.bf16.mxu0 %v2853_v2  ;;  %v2720_v35 = vld [vmem:[%s3025_s25 + $0x40] sm:$0xff]   ;;  %v2707_v37 = vld [vmem:[%s3422_s17 + $0x70] sm:$0xff]   ;;  %v2709_v38 = vld [vmem:[%s3422_s17 + $0x68] sm:$0xff]   ;;  %s3423_s25 = sld [smem:[#allocation19_spill]] }
  0x4b   : > { %2436 = vmatprep.subr.bf16.mxu1 %v2853_v2  ;;  %v2711_v39 = vld [vmem:[%s3422_s17 + $0x60] sm:$0xff]   ;;  %v2713_v40 = vld [vmem:[%s3422_s17 + $0x58] sm:$0xff]   ;;  %v2715_v41 = vld [vmem:[%s3422_s17 + $0x50] sm:$0xff]  }
  0x4c   : > { %v2717_v42 = vld [vmem:[%s3422_s17 + $0x48] sm:$0xff]   ;;  %v2719_v43 = vld [vmem:[%s3422_s17 + $0x40] sm:$0xff]   ;;  %v2721_v44 = vld [vmem:[%s3035_s22 + $0x78] sm:$0xff]  }
  0x4d   : > { %2419 = vmatpush3.bf16.msra.mxu0 %v2687_v8  ;;  %v2722_v45 = vld [vmem:[%s3035_s22 + $0x70] sm:$0xff]   ;;  %v2723_v46 = vld [vmem:[%s3035_s22 + $0x68] sm:$0xff]   ;;  %v2724_v47 = vld [vmem:[%s3035_s22 + $0x60] sm:$0xff]  }
  0x4e   : > { %2437 = vmatpush3.bf16.msra.mxu1 %v2686_v7  ;;  %2420 = vmatprep.subr.bf16.mxu0 %v2853_v2  ;;  %v2725_v48 = vld [vmem:[%s3035_s22 + $0x58] sm:$0xff]   ;;  %v2726_v49 = vld [vmem:[%s3035_s22 + $0x50] sm:$0xff]   ;;  %v2727_v50 = vld [vmem:[%s3035_s22 + $0x48] sm:$0xff]  }
  0x4f   : > { %2438 = vmatprep.subr.bf16.mxu1 %v2853_v2  ;;  %v2728_v51 = vld [vmem:[%s3035_s22 + $0x40] sm:$0xff]  }
  0x50   : > { %s3425_s24 = scalar_lea.vmem %s3424_s30, %s3423_s25  ;;  %s3428_s25 = sld [smem:[#allocation9_spill]] }
  0x51   : > { %2421 = vmatpush3.bf16.msra.mxu0 %v2689_v10 }
  0x52   : > { %2439 = vmatpush3.bf16.msra.mxu1 %v2688_v9  ;;  %2422 = vmatprep.subr.bf16.mxu0 %v2853_v2 }
  0x53   : > { %2440 = vmatprep.subr.bf16.mxu1 %v2853_v2 }
  0x55   : > { %2423 = vmatpush3.bf16.msra.mxu0 %v2691_v12 }
  0x56   : > { %2441 = vmatpush3.bf16.msra.mxu1 %v2690_v11  ;;  %2424 = vmatprep.subr.bf16.mxu0 %v2853_v2  ;;  %p2317_p1 = scmp.ne.s32.totalorder %s3428_s25, 1 }
  0x57   : > { %2442 = vmatprep.subr.bf16.mxu1 %v2853_v2 }
  0x59   : > { %2425 = vmatpush3.bf16.msra.mxu0 %v2693_v14 }
  0x5a   : > { %2443 = vmatpush3.bf16.msra.mxu1 %v2692_v13  ;;  %2426 = vmatprep.subr.bf16.mxu0 %v2853_v2 }
  0x5b   : > { %2444 = vmatprep.subr.bf16.mxu1 %v2853_v2 }
  0x5d   : > { %2427 = vmatpush3.bf16.msra.mxu0 %v2695_v16 }
  0x5e   : > { %2445 = vmatpush3.bf16.msra.mxu1 %v2694_v15  ;;  %2452 = vmatprep.subr.bf16.mxu0 %v2853_v2 }
  0x5f   : > { %2446 = vmatprep.subr.bf16.mxu1 %v2853_v2 }
  0x60   : > { %2429 = vmatmul.mubr.bf16.vlgmr.msra.gmra.mxu0 %v3120_v19 }
  0x61   : > { %2453 = vmatpush3.bf16.msra.mxu0 %v2697_v20  ;;  %2468 = vmatprep.mubr.msk.bf16.mxu0 %vm2854_vm0, %v2853_v2 }
  0x62   : > { %2447 = vmatpush3.bf16.msra.mxu1 %v2696_v18  ;;  %2454 = vmatprep.subr.bf16.mxu0 %v2853_v2 }
  0x63   : > { %2472 = vmatprep.subr.bf16.mxu1 %v2853_v2 }
  0x65   : > { %2449 = vmatmul.mubr.bf16.vlgmr.msra.gmra.mxu1 %v3120_v19  ;;  %2455 = vmatpush3.bf16.msra.mxu0 %v2698_v22 }
  0x66   : > { %2473 = vmatpush3.bf16.msra.mxu1 %v2706_v21  ;;  %2488 = vmatprep.mubr.msk.bf16.mxu1 %vm2854_vm0, %v2853_v2 }
  0x67   : > { %2474 = vmatprep.subr.bf16.mxu1 %v2853_v2  ;;  %2456 = vmatprep.subr.bf16.mxu0 %v2853_v2 }
  0x69   : > { %2457 = vmatpush3.bf16.msra.mxu0 %v2699_v24  ;;  %v2286_v24 = vld [vmem:[%s3425_s24] ss:$0 sm:$0xff] }
  0x6a   : > { %2475 = vmatpush3.bf16.msra.mxu1 %v2708_v23  ;;  %2458 = vmatprep.subr.bf16.mxu0 %v2853_v2 }
  0x6b   : > { %2476 = vmatprep.subr.bf16.mxu1 %v2853_v2 }
  0x6d   : > { %2459 = vmatpush3.bf16.msra.mxu0 %v2700_v25 }
  0x6e   : > { %2477 = vmatpush3.bf16.msra.mxu1 %v2710_v26  ;;  %2460 = vmatprep.subr.bf16.mxu0 %v2853_v2 }
  0x6f   : > { %2478 = vmatprep.subr.bf16.mxu1 %v2853_v2 }
  0x71   : > { %2461 = vmatpush3.bf16.msra.mxu0 %v2701_v28 }
  0x72   : > { %2479 = vmatpush3.bf16.msra.mxu1 %v2712_v27  ;;  %2462 = vmatprep.subr.bf16.mxu0 %v2853_v2 }
  0x73   : > { %2480 = vmatprep.subr.bf16.mxu1 %v2853_v2 }
  0x75   : > { %2463 = vmatpush3.bf16.msra.mxu0 %v2702_v30 }
  0x76   : > { %2481 = vmatpush3.bf16.msra.mxu1 %v2714_v29  ;;  %2464 = vmatprep.subr.bf16.mxu0 %v2853_v2 }
  0x77   : > { %2482 = vmatprep.subr.bf16.mxu1 %v2853_v2 }
  0x79   : > { %2465 = vmatpush3.bf16.msra.mxu0 %v2703_v32 }
  0x7a   : > { %2483 = vmatpush3.bf16.msra.mxu1 %v2716_v31  ;;  %2466 = vmatprep.subr.bf16.mxu0 %v2853_v2 }
  0x7b   : > { %2484 = vmatprep.subr.bf16.mxu1 %v2853_v2 }
  0x7d   : > { %2467 = vmatpush3.bf16.msra.mxu0 %v2704_v34 }
  0x7e   : > { %2485 = vmatpush3.bf16.msra.mxu1 %v2718_v33  ;;  %2492 = vmatprep.subr.bf16.mxu0 %v2853_v2 }
  0x7f   : > { %2486 = vmatprep.subr.bf16.mxu1 %v2853_v2 }
  0x80   : > { %2469 = vmatmul.mubr.bf16.vlgmr.msra.gmra.mxu0 %v3120_v19 }
  0x81   : > { %2493 = vmatpush3.bf16.msra.mxu0 %v2705_v36  ;;  %2508 = vmatprep.mubr.msk.bf16.mxu0 %vm2854_vm0, %v2853_v2 }
  0x82   : > { %2487 = vmatpush3.bf16.msra.mxu1 %v2720_v35  ;;  %2494 = vmatprep.subr.bf16.mxu0 %v2853_v2 }
  0x83   : > { %2512 = vmatprep.subr.bf16.mxu1 %v2853_v2 }
  0x85   : > { %2489 = vmatmul.mubr.bf16.vlgmr.msra.gmra.mxu1 %v3120_v19  ;;  %2495 = vmatpush3.bf16.msra.mxu0 %v2707_v37 }
  0x86   : > { %2528 = vmatprep.mubr.msk.bf16.mxu1 %vm2854_vm0, %v2853_v2  ;;  %2496 = vmatprep.subr.bf16.mxu0 %v2853_v2 }
  0x87   : > { %2513 = vmatpush3.bf16.msra.mxu1 %v2721_v44 }
  0x88   : > { %2514 = vmatprep.subr.bf16.mxu1 %v2853_v2 }
  0x89   : > { %2497 = vmatpush3.bf16.msra.mxu0 %v2709_v38 }
  0x8a   : > { %2498 = vmatprep.subr.bf16.mxu0 %v2853_v2 }
  0x8b   : > { %2515 = vmatpush3.bf16.msra.mxu1 %v2722_v45 }
  0x8c   : > { %2516 = vmatprep.subr.bf16.mxu1 %v2853_v2 }
  0x8d   : > { %2499 = vmatpush3.bf16.msra.mxu0 %v2711_v39 }
  0x8e   : > { %2500 = vmatprep.subr.bf16.mxu0 %v2853_v2 }
  0x8f   : > { %2517 = vmatpush3.bf16.msra.mxu1 %v2723_v46 }
  0x90   : > { %2518 = vmatprep.subr.bf16.mxu1 %v2853_v2 }
  0x91   : > { %2501 = vmatpush3.bf16.msra.mxu0 %v2713_v40 }
  0x92   : > { %2502 = vmatprep.subr.bf16.mxu0 %v2853_v2 }
  0x93   : > { %2519 = vmatpush3.bf16.msra.mxu1 %v2724_v47 }
  0x94   : > { %2520 = vmatprep.subr.bf16.mxu1 %v2853_v2 }
  0x95   : > { %2503 = vmatpush3.bf16.msra.mxu0 %v2715_v41 }
  0x96   : > { %2504 = vmatprep.subr.bf16.mxu0 %v2853_v2 }
  0x97   : > { %2521 = vmatpush3.bf16.msra.mxu1 %v2725_v48 }
  0x98   : > { %2522 = vmatprep.subr.bf16.mxu1 %v2853_v2 }
  0x99   : > { %2505 = vmatpush3.bf16.msra.mxu0 %v2717_v42 }
  0x9a   : > { %2506 = vmatprep.subr.bf16.mxu0 %v2853_v2 }
  0x9b   : > { %2523 = vmatpush3.bf16.msra.mxu1 %v2726_v49 }
  0x9c   : > { %2524 = vmatprep.subr.bf16.mxu1 %v2853_v2 }
  0x9d   : > { %2507 = vmatpush3.bf16.msra.mxu0 %v2719_v43 }
  0x9e   : > { %2532 = vmatprep.subr.bf16.mxu0 %v2853_v2 }
  0x9f   : > { %2525 = vmatpush3.bf16.msra.mxu1 %v2727_v50 }
  0xa0   : > { %2509 = vmatmul.mubr.bf16.vlgmr.msra.gmra.mxu0 %v3120_v19  ;;  %2526 = vmatprep.subr.bf16.mxu1 %v2853_v2 }
  0xa1   : > { %2534 = vmatprep.mubr.msk.bf16.mxu0 %vm2854_vm0, %v2853_v2 }
  0xa3   : > { %2527 = vmatpush3.bf16.msra.mxu1 %v2728_v51 }
  0xa4   : > { %2538 = vmatprep.subr.bf16.mxu1 %v2853_v2 }
  0xa6   : > { %2529 = vmatmul.mubr.bf16.vlgmr.msra.gmra.mxu1 %v3120_v19 }
  0xa7   : > { %2540 = vmatprep.mubr.msk.bf16.mxu1 %vm2854_vm0, %v2853_v2 }
 0x120   : > { %v801_v52 = vpop.f32.mrf.mxu0 }
 0x121   : > { %v1330_v62 = vpack.c.bf16 %v801_v52, %v801_v52 }
 0x122   : > { %v2430_v55 = vpop.f32.mrf.mxu0 }
 0x123   : > { %v2729_v55 = vld [vmem:[%s3041_s0] sm:$0xff]  }
 0x124   : > { %v804_v58 = vpop.f32.mrf.mxu0 }
 0x125   : > { %v905_v53 = vpop.f32.mrf.mxu1 }
 0x126   : > { %v1332_v54 = vpack.c.bf16 %v905_v53, %v905_v53  ;;  %v2431_v60 = vpop.f32.mrf.mxu0 }
 0x127   : > { %v2450_v56 = vpop.f32.mrf.mxu1 }
 0x128   : > { %v1347_v57 = vsel %vm1342_vm1, %v1332_v54, 0  ;;  %v2730_v56 = vld [vmem:[%s3041_s0 + $0x8] sm:$0xff]  }
 0x129   : > { %2533 = vmatpush3.bf16.xpose.msra.mxu0 %v1347_v57  ;;  %v908_v59 = vpop.f32.mrf.mxu1 }
 0x12a   : > { %2544 = vmatprep.subr.bf16.mxu0 %v2853_v2 }
 0x12b   : > { %v2451_v61 = vpop.f32.mrf.mxu1 }
 0x130   : > { %2535 = vmatmul.mubr.msk.bf16.vlgmr.msra.gmra.mxu0 %vm1342_vm1, %v1330_v62 }
 0x131   : > { %2546 = vmatprep.mubr.msk.bf16.mxu0 %vm2854_vm0, %v2853_v2 }
 0x140   : > { %v1009_v63 = vpop.f32.mrf.mxu0 }
 0x141   : > { %v1334_v0 = vpack.c.bf16 %v1009_v63, %v1009_v63 }
 0x142   : > { %v2470_v1 = vpop.f32.mrf.mxu0 }
 0x143   : > { %v1465_v4 = vsel %vm1463_vm2, %v1334_v0, 0 }
 0x144   : > { %v1012_v5 = vpop.f32.mrf.mxu0  ;;  %2545 = vmatpush3.bf16.msra.mxu0 %v1465_v4 }
 0x145   : > { %v1114_v3 = vpop.f32.mrf.mxu1  ;;  %2556 = vmatprep.subr.bf16.mxu0 %v2853_v2 }
 0x146   : > { %v2471_v7 = vpop.f32.mrf.mxu0  ;;  %v1331_v16 = vpack.c.bf16 %v1114_v3, %v1114_v3 }
 0x147   : > { %v2490_v6 = vpop.f32.mrf.mxu1 }
 0x149   : > { %v1117_v8 = vpop.f32.mrf.mxu1 }
 0x14b   : > { %v2491_v9 = vpop.f32.mrf.mxu1 }
 0x160   : > { %v1219_v10 = vpop.f32.mrf.mxu0 }
 0x161   : > { %v1333_v11 = vpack.c.bf16 %v1219_v10, %v1219_v10 }
 0x162   : > { %v2510_v12 = vpop.f32.mrf.mxu0 }
 0x163   : > { %v1393_v13 = vsel %vm1342_vm1, %v1333_v11, 0 }
 0x164   : > { %v1222_v14 = vpop.f32.mrf.mxu0  ;;  %2539 = vmatpush3.bf16.xpose.msra.mxu1 %v1393_v13 }
 0x165   : > { %2550 = vmatprep.subr.bf16.mxu1 %v2853_v2 }
 0x166   : > { %v2511_v15 = vpop.f32.mrf.mxu0  ;;  %v1324_v18 = vpop.f32.mrf.mxu1 }
 0x167   : > { %v1335_v19 = vpack.c.bf16 %v1324_v18, %v1324_v18  ;;  %v2731_v15 = vld [vmem:[%s3055_s29 + $0x38] sm:$0xff]   ;;  %v2733_v18 = vld [vmem:[%s3055_s29 + $0x28] sm:$0xff]  }
 0x168   : > { %v2530_v20 = vpop.f32.mrf.mxu1 }
 0x169   : > { %v1511_v21 = vsel %vm1463_vm2, %v1335_v19, 0  ;;  %v2735_v19 = vld [vmem:[%s3055_s29 + $0x18] sm:$0xff]   ;;  %v2736_v20 = vld [vmem:[%s3055_s29 + $0x10] sm:$0xff]  }
 0x16a   : > { %v1327_v22 = vpop.f32.mrf.mxu1 }
 0x16b   : > { %2541 = vmatmul.mubr.msk.bf16.vlgmr.msra.gmra.mxu1 %vm1342_vm1, %v1331_v16  ;;  %v2732_v16 = vld [vmem:[%s3055_s29 + $0x30] sm:$0xff]   ;;  %v2738_v22 = vld [vmem:[%s3055_s29] sm:$0xff]  }
 0x16c   : > { %2552 = vmatprep.mubr.msk.bf16.mxu1 %vm2854_vm0, %v2853_v2  ;;  %2551 = vmatpush3.bf16.msra.mxu1 %v1511_v21  ;;  %v2531_v23 = vpop.f32.mrf.mxu1  ;;  %v2737_v21 = vld [vmem:[%s3055_s29 + $0x8] sm:$0xff]  }
 0x16d   : > { %2562 = vmatprep.subr.bf16.mxu1 %v2853_v2  ;;  %v2739_v23 = vld [vmem:[%s3064_s4 + $0x38] sm:$0xff]  }
 0x1f0   : > { %v1383_v25 = vpop.f32.mrf.mxu0 }
 0x1f1   : > { %v1384_v26 = vadd.f32 %v2286_v24, %v1383_v25  ;;  %v2741_v25 = vld [vmem:[%s3064_s4 + $0x28] sm:$0xff]  }
 0x1f2   : > { %v2536_v27 = vpop.f32.mrf.mxu0 }
 0x1f3   : > { %v1436_v28 = vsel %vm1435_vm3, %v1384_v26, -inf  ;;  %v2743_v27 = vld [vmem:[%s3064_s4 + $0x18] sm:$0xff]  }
 0x1f4   : > { %1437 = vmax.xlane.f32.xlu0 %v1436_v28  ;;  %v1386_v29 = vpop.f32.mrf.mxu0  ;;  %v2744_v28 = vld [vmem:[%s3064_s4 + $0x10] sm:$0xff]  }
 0x1f6   : > { %v2537_v30 = vpop.f32.mrf.mxu0 }
 0x22b   : > { %v1429_v31 = vpop.f32.mrf.mxu1 }
 0x22c   : > { %v1430_v32 = vadd.f32 %v2286_v24, %v1429_v31  ;;  %v2740_v24 = vld [vmem:[%s3064_s4 + $0x30] sm:$0xff]  }
 0x22d   : > { %v2542_v33 = vpop.f32.mrf.mxu1 }
 0x22e   : > { %v1439_v34 = vsel %vm1435_vm3, %v1430_v32, -inf }
 0x22f   : > { %v1432_v35 = vpop.f32.mrf.mxu1  ;;  %1440 = vmax.xlane.f32.xlu0 %v1439_v34 }
 0x231   : > { %v2543_v36 = vpop.f32.mrf.mxu1 }
 0x27d   : > { %v1438_v37 = vpop.xlane.xlu0 %1437 }
 0x27e   : > { %v1442_v38 = vsub.f32 %v1384_v26, %v1438_v37  ;;  %v2742_v26 = vld [vmem:[%s3064_s4 + $0x20] sm:$0xff]  }
 0x280   : > { %v1444_v39 = vmul.f32 1.442695, %v1442_v38 }
 0x282   : > { %2747 = vpow2.f32 %v1444_v39  ;;  %v2295_v39 = vld [vmem:[%s3426_s15] ss:$0 sm:$0xff] }
 0x28f   : > { %v2748_v40 = vpop.eup %2747 }
 0x290   : > { %v1448_v41 = vsel %vm1435_vm3, %v2748_v40, 0.0 }
 0x291   : > { %1449 = vadd.xlane.f32.xlu1 %v1448_v41  ;;  %v2296_v41 = vld [vmem:[%s3427_s14] ss:$0 sm:$0xff] }
 0x2b8   : > { %v1441_v42 = vpop.xlane.xlu0 %1440 }
 0x2b9   : > { %v1443_v43 = vsub.f32 %v1430_v32, %v1441_v42 }
 0x2bb   : > { %v1446_v44 = vmul.f32 1.442695, %v1443_v43 }
 0x2bd   : > { %2749 = vpow2.f32 %v1446_v44 }
 0x2ca   : > { %v2750_v45 = vpop.eup %2749 }
 0x2cb   : > { %v1451_v46 = vsel %vm1435_vm3, %v2750_v45, 0.0 }
 0x2cc   : > { %1452 = vadd.xlane.f32.xlu1 %v1451_v46  ;;  %v2746_v46 = vld [vmem:[%s3064_s4] sm:$0xff]  }
 0x31a   : > { %v1450_v47 = vpop.xlane.xlu1 %1449 }
 0x31b   : > { %2751 = vrcp.f32 %v1450_v47  ;;  %v2297_v47 = vld [vmem:[%s678_s21] ss:$0 sm:$0xff] }
 0x328   : > { %v2752_v48 = vpop.eup %2751 }
 0x329   : > { %v1456_v49 = vmul.f32 %v2752_v48, %v2748_v40 }
 0x32b   : > { %v1458_v50 = vpack.c.bf16 %v1456_v49, %v1456_v49 }
 0x32d   : > { %2547 = vmatmul.mubr.msk.bf16.vlgmr.msra.gmra.mxu0 %vm1435_vm3, %v1458_v50 }
 0x32e   : > { %2558 = vmatprep.mubr.msk.bf16.mxu0 %vm2854_vm0, %v2853_v2  ;;  %2557 = vmatpush3.bf16.msra.mxu0 %v2729_v55 }
 0x32f   : > { %2568 = vmatprep.subr.bf16.mxu0 %v2853_v2 }
 0x355   : > { %v1453_v51 = vpop.xlane.xlu1 %1452 }
 0x356   : > { %2753 = vrcp.f32 %v1453_v51 }
 0x363   : > { %v2754_v52 = vpop.eup %2753 }
 0x364   : > { %v1457_v53 = vmul.f32 %v2754_v52, %v2750_v45  ;;  %v2745_v45 = vld [vmem:[%s3064_s4 + $0x8] sm:$0xff]  }
 0x366   : > { %v1459_v54 = vpack.c.bf16 %v1457_v53, %v1457_v53 }
 0x368   : > { %2553 = vmatmul.mubr.msk.bf16.vlgmr.msra.gmra.mxu1 %vm1435_vm3, %v1459_v54 }
 0x369   : > { %2564 = vmatprep.mubr.msk.bf16.mxu1 %vm2854_vm0, %v2853_v2  ;;  %2563 = vmatpush3.bf16.msra.mxu1 %v2730_v56 }
 0x36a   : > { %2588 = vmatprep.subr.bf16.mxu1 %v2853_v2 }
 0x3ed   : > { %v1501_v57 = vpop.f32.mrf.mxu0 }
 0x3ee   : > { %v1553_v58 = vpack.c.bf16 %v1501_v57, %v1501_v57 }
 0x3ef   : > { %v2548_v59 = vpop.f32.mrf.mxu0 }
 0x3f0   : > { %2559 = vmatmul.mubr.msk.bf16.vlgmr.msra.gmra.mxu0 %vm1342_vm1, %v1553_v58 }
 0x3f1   : > { %v1504_v60 = vpop.f32.mrf.mxu0  ;;  %2584 = vmatprep.mubr.msk.bf16.mxu0 %vm2854_vm0, %v2853_v2  ;;  %2569 = vmatpush3.bf16.msra.mxu0 %v2731_v15 }
 0x3f2   : > { %2570 = vmatprep.subr.bf16.mxu0 %v2853_v2 }
 0x3f3   : > { %v2549_v61 = vpop.f32.mrf.mxu0 }
 0x3f5   : > { %2571 = vmatpush3.bf16.msra.mxu0 %v2732_v16 }
 0x3f6   : > { %2572 = vmatprep.subr.bf16.mxu0 %v2853_v2 }
 0x3f9   : > { %2573 = vmatpush3.bf16.msra.mxu0 %v2733_v18 }
 0x3fa   : > { %2574 = vmatprep.subr.bf16.mxu0 %v2853_v2 }
 0x428   : > { %v1547_v62 = vpop.f32.mrf.mxu1 }
 0x429   : > { %v1554_v63 = vpack.c.bf16 %v1547_v62, %v1547_v62 }
 0x42a   : > { %v2554_v0 = vpop.f32.mrf.mxu1 }
 0x42b   : > { %2565 = vmatmul.mubr.msk.bf16.vlgmr.msra.gmra.mxu1 %vm1342_vm1, %v1554_v63 }
 0x42c   : > { %v1550_v1 = vpop.f32.mrf.mxu1  ;;  %2604 = vmatprep.mubr.msk.bf16.mxu1 %vm2854_vm0, %v2853_v2  ;;  %2589 = vmatpush3.bf16.msra.mxu1 %v2739_v23 }
 0x42d   : > { %2590 = vmatprep.subr.bf16.mxu1 %v2853_v2 }
 0x42e   : > { %v2555_v3 = vpop.f32.mrf.mxu1 }
 0x430   : > { %2591 = vmatpush3.bf16.msra.mxu1 %v2740_v24 }
 0x431   : > { %2592 = vmatprep.subr.bf16.mxu1 %v2853_v2 }
 0x434   : > { %2593 = vmatpush3.bf16.msra.mxu1 %v2741_v25 }
 0x435   : > { %2594 = vmatprep.subr.bf16.mxu1 %v2853_v2 }
 0x438   : > { %2595 = vmatpush3.bf16.msra.mxu1 %v2742_v26 }
 0x439   : > { %2596 = vmatprep.subr.bf16.mxu1 %v2853_v2 }
 0x43c   : > { %2597 = vmatpush3.bf16.msra.mxu1 %v2743_v27 }
 0x43d   : > { %2598 = vmatprep.subr.bf16.mxu1 %v2853_v2 }
 0x440   : > { %2599 = vmatpush3.bf16.msra.mxu1 %v2744_v28 }
 0x441   : > { %2600 = vmatprep.subr.bf16.mxu1 %v2853_v2 }
 0x444   : > { %2601 = vmatpush3.bf16.msra.mxu1 %v2745_v45 }
 0x445   : > { %2602 = vmatprep.subr.bf16.mxu1 %v2853_v2 }
 0x448   : > { %2603 = vmatpush3.bf16.msra.mxu1 %v2746_v46 }
 0x4b0   : > { %v1602_v4 = vpop.f32.mrf.mxu0 }
 0x4b2   : > { %v2560_v5 = vpop.f32.mrf.mxu0 }
 0x4b4   : > { %v1605_v6 = vpop.f32.mrf.mxu0 }
 0x4b6   : > { %v2561_v7 = vpop.f32.mrf.mxu0 }
 0x4eb   : > { %v1651_v8 = vpop.f32.mrf.mxu1 }
 0x4ec   : > { %v1657_v9 = vadd.f32 %v1651_v8, %v1602_v4 }
 0x4ed   : > { %v2566_v10 = vpop.f32.mrf.mxu1 }
 0x4ee   : > { %v1658_v11 = vadd.f32 %v1657_v9, %v3113_v17  ;;  %v2734_v17 = vld [vmem:[%s3055_s29 + $0x20] sm:$0xff]  }
 0x4ef   : > { %v1654_v12 = vpop.f32.mrf.mxu1  ;;  %2575 = vmatpush3.bf16.msra.mxu0 %v2734_v17  ;;  %v2315_v9 = vld [vmem:[%s689_s20] ss:$0 sm:$0xff] }
 0x4f0   : > { %1661 = vadd.xlane.f32.xlu0 %v1658_v11  ;;  %v1664_v13 = vmul.f32 %v1658_v11, %v1658_v11  ;;  %2576 = vmatprep.subr.bf16.mxu0 %v2853_v2 }
 0x4f1   : > { %v2567_v14 = vpop.f32.mrf.mxu1 }
 0x4f2   : > { %1665 = vadd.xlane.f32.xlu1 %v1664_v13 }
 0x4f3   : > { %2577 = vmatpush3.bf16.msra.mxu0 %v2735_v19 }
 0x4f4   : > { %2578 = vmatprep.subr.bf16.mxu0 %v2853_v2 }
 0x4f7   : > { %2579 = vmatpush3.bf16.msra.mxu0 %v2736_v20 }
 0x4f8   : > { %2580 = vmatprep.subr.bf16.mxu0 %v2853_v2 }
 0x4fb   : > { %2581 = vmatpush3.bf16.msra.mxu0 %v2737_v21 }
 0x4fc   : > { %2582 = vmatprep.subr.bf16.mxu0 %v2853_v2  ;;  %v2306_v2 = vld [vmem:[%s686_s2] ss:$0 sm:$0xff] }
 0x4ff   : > { %2583 = vmatpush3.bf16.msra.mxu0 %v2738_v22 }
 0x579   : > { %v1662_v29 = vpop.xlane.xlu0 %1661 }
 0x57a   : > { %v1663_v30 = vmul.f32 0.03125, %v1662_v29 }
 0x57b   : > { %v1666_v31 = vpop.xlane.xlu1 %1665 }
 0x57c   : > { %v1668_v32 = vmul.f32 %v1663_v30, %v1663_v30  ;;  %v1667_v33 = vmul.f32 0.03125, %v1666_v31  ;;  %v1671_v37 = vsub.f32 %v1658_v11, %v1663_v30  ;;  %v2316_v11 = vld [vmem:[%s692_s5] ss:$0 sm:$0xff] }
 0x57e   : > { %v1669_v34 = vsub.f32 %v1667_v33, %v1668_v32 }
 0x580   : > { %v1670_v35 = vmax.f32 %v1669_v34, 0.0 }
 0x582   : > { %v1672_v36 = vadd.f32 1e-06, %v1670_v35 }
 0x584   : > { %2755 = vrsqrt.f32 %v1672_v36 }
 0x591   : > { %v2756_v38 = vpop.eup %2755 }
 0x592   : > { %v1674_v40 = vmul.f32 %v2756_v38, %v1671_v37 }
 0x594   : > { %v1681_v42 = vmul.f32 %v2295_v39, %v1674_v40 }
 0x596   : > { %v1688_v43 = vadd.f32 %v2296_v41, %v1681_v42 }
 0x598   : > { %v1689_v44 = vpack.c.bf16 %v1688_v43, %v1688_v43 }
 0x59a   : > { %2585 = vmatmul.mubr.bf16.vlgmr.msra.gmra.mxu0 %v1689_v44 }
 0x65a   : > { %v1795_v48 = vpop.f32.mrf.mxu0 }
 0x65b   : > { %v1796_v49 = vadd.f32 %v2297_v47, %v1795_v48 }
 0x65c   : > { %v2586_v50 = vpop.f32.mrf.mxu0 }
 0x65d   : > { %v1801_v51 = vmax.f32 %v1796_v49, 0.0 }
 0x65e   : > { %v1798_v52 = vpop.f32.mrf.mxu0 }
 0x65f   : > { %v1802_v53 = vpack.c.bf16 %v1801_v51, %v1801_v51 }
 0x660   : > { %v2587_v54 = vpop.f32.mrf.mxu0 }
 0x661   : > { %2605 = vmatmul.mubr.bf16.vlgmr.msra.gmra.mxu1 %v1802_v53 }
 0x721   : > { %v1908_v55 = vpop.f32.mrf.mxu1 }
 0x722   : > { %v1909_v56 = vadd.f32 %v2306_v2, %v1908_v55 }
 0x723   : > { %v2606_v57 = vpop.f32.mrf.mxu1 }
 0x724   : > { %v1914_v58 = vadd.f32 %v1909_v56, %v1688_v43 }
 0x725   : > { %v1911_v59 = vpop.f32.mrf.mxu1 }
 0x726   : > { %1917 = vadd.xlane.f32.xlu0 %v1914_v58  ;;  %v1920_v60 = vmul.f32 %v1914_v58, %v1914_v58 }
 0x727   : > { %v2607_v61 = vpop.f32.mrf.mxu1 }
 0x728   : > { %1921 = vadd.xlane.f32.xlu1 %v1920_v60 }
 0x7af   : > { %v1918_v62 = vpop.xlane.xlu0 %1917 }
 0x7b0   : > { %v1919_v63 = vmul.f32 0.03125, %v1918_v62 }
 0x7b1   : > { %v1922_v0 = vpop.xlane.xlu1 %1921 }
 0x7b2   : > { %v1924_v1 = vmul.f32 %v1919_v63, %v1919_v63  ;;  %v1923_v3 = vmul.f32 0.03125, %v1922_v0  ;;  %v1927_v7 = vsub.f32 %v1914_v58, %v1919_v63 }
 0x7b4   : > { %v1925_v4 = vsub.f32 %v1923_v3, %v1924_v1 }
 0x7b6   : > { %v1926_v5 = vmax.f32 %v1925_v4, 0.0 }
 0x7b8   : > { %v1928_v6 = vadd.f32 1e-06, %v1926_v5 }
 0x7ba   : > { %2757 = vrsqrt.f32 %v1928_v6 }
 0x7c7   : > { %v2758_v8 = vpop.eup %2757 }
 0x7c8   : > { %v1930_v10 = vmul.f32 %v2758_v8, %v1927_v7 }
 0x7ca   : > { %v1937_v12 = vmul.f32 %v2315_v9, %v1930_v10  ;;  %1949 = sbr.rel (%p2317_p1) target bundleno = 2000 (0x7d0), region = 84 }
 0x7cc   : > { %v1944_v13 = vadd.f32 %v2316_v11, %v1937_v12 }
 0x7ce   : > { %1945 = vst [vmem:[#allocation2] sm:$0xff] %v1944_v13 }
 0x7cf   : > { %1950 = vst [vmem:[%s637_s8] sm:$0xff] %v1944_v13 }
 0x7d0 PF: > { %s3429_s26 = sld [smem:[#allocation10_spill]]  ;;  %s1965_s5 = sshll.u32 %s637_s8, 4  ;;  %s1966_s5 = int_to_ptr.vmem [resolvable:$true] %s1965_s5 }
 0x7d1   : > { %s3430_s22 = sld [smem:[#allocation7_spill]]  ;;  %s2759_s14 = scalar_lea.vmem %s1966_s5, 128 }
 0x7d2   : > { %s3432_s29 = sld [smem:[#allocation28_spill]]  ;;  %p2760_p2 = scmp.ne.s32.totalorder %s1966_s5, %s2759_s14 }
 0x7d3   : > { %s2855_s18 = smov [#allocation3]  }
 0x7d4   : > { %p2761_p4 = pnand %p2760_p2, %p2980_p3  ;;  %s2763_s3 = sshll.u32 %s2855_s18, 4  ;;  %s2764_s3 = int_to_ptr.vmem [resolvable:$false] %s2763_s3 }
 0x7d5   : > { %s2765_s16 = scalar_lea.vmem %s2764_s3, 256  ;;  %p2766_p6 = scmp.lt.s32.totalorder %s1966_s5, %s2764_s3 }
 0x7d6   : > { %s2319_s30 = sshll.u32 %s3429_s26, 7  ;;  %p2762_p5 = pneg %p2761_p4 }
 0x7d7   : > { %s3434_s15 = sand.u32 1, %s3430_s22   ;;  %p2767_p7 = scmp.lt.s32.totalorder %s2765_s16, %s2759_s14 }
 0x7d8   : > { %s3433_s28 = smov %s3432_s29  ;;  %s1963_s27 = scalar_lea.hbm %s3432_s29, %s2319_s30 }
 0x7d9   : > { %s1952_s1 = scalar_lea.sflag [#allocation4], %s3434_s15  ;;  %p2768_p8 = por %p2767_p7, %p2766_p6 }
 0x7db   : > { %p2769_p10 = pnand %p2768_p8, %p2762_p5 }
 0x7dd   : > { %2772 = shalt.err (!%p2769_p10)
}
 0x7de   : > { %s2773_s19 = scalar_lea.hbm %s1963_s27, 128  ;;  %s2777_s4 = scalar_lea.hbm %s3433_s28, 256 }
 0x7df   : > { %p2774_p11 = scmp.ne.s32.totalorder %s1963_s27, %s2773_s19  ;;  %p2778_p0 = scmp.lt.s32.totalorder %s1963_s27, %s3433_s28 }
 0x7e0   : > { %p2779_p1 = scmp.lt.s32.totalorder %s2777_s4, %s2773_s19 }
 0x7e1   : > { %p2775_p12 = pnand %p2774_p11, %p2980_p3 }
 0x7e2   : > { %p2780_p2 = por %p2779_p1, %p2778_p0 }
 0x7e3   : > { %p2776_p13 = pneg %p2775_p12 }
 0x7e5   : > { %p2781_p4 = pnand %p2780_p2, %p2776_p13 }
 0x7e7   : > { %2784 = shalt.err (!%p2781_p4)
}
 0x7e8   : > { %2608 = dma.vmem_to_hbm [thread:$0]  (%p2980_p3), %s1966_s5, 128, %s1963_s27, %s1952_s1  }
 0x7e9 PF: > { %s3435_s17 = sld [smem:[#allocation13_spill]] }
 0x7ea   : > { %s3436_s25 = sld [smem:[#allocation6_spill]] }
 0x7ef   : > { %p2614_p5 = scmp.ge.s32.totalorder %s3435_s17, 2 }
 0x7f0   : > { %s1977_s22 = sand.u32 1, %s3436_s25  }
 0x7f1   : > { %p2611_p6 = pnand %p2614_p5, %p2990_p9  ;;  %s1978_s30 = scalar_lea.sflag [#allocation4], %s1977_s22 }
 0x7f3   : > { %p2612_p7 = pneg %p2611_p6 }
 0x7f5   : > { %2818 = dma.done.wait (%p2612_p7), %s1978_s30, 128  }
 0x7f6   : > { %2820 = vsyncadd (%p2612_p7), %s1978_s30, 4294967168  ;;  %s27_s20 = sadd.s32 1, %s3435_s17   ;;  %s3438_s29 = sld [smem:[#allocation7_spill]] }
 0x7f7   : > { %p24_p8 = scmp.ge.s32.totalorder %s27_s20, 6   ;;  %s3439_s30 = sld [smem:[#allocation8_spill]] }
 0x7f8   : > { %s3440_s15 = sld [smem:[#allocation18_spill]] }
 0x7f9   : > { %s3441_s16 = sld [smem:[#allocation11_spill]]  ;;  %26 = sbr.rel (!%p24_p8) target bundleno = 14 (0xe), region = 161 }
 0x7fa   : > { %s3442_s17 = sld [smem:[#allocation12_spill]] }
 0x7fb   : > { %s3443_s18 = sld [smem:[#allocation14_spill]] }
 0x7fc   : > { %s3444_s19 = sld [smem:[#allocation16_spill]] }
 0x7fe   :  { %1983 = vsyncpa [#allocation4], 1 }
 0x7ff   :  { %1985 = vsyncpa [#allocation4 + $0x1], 1 }

</bundles_post_ra>
